<compile_context>
chip_gen: v5e
topology: v5e:2x2
jax: 0.10.0
libtpu: 0.0.40
codegen_flags: <defaults>
</compile_context>

<pallas_src>
import functools

import jax
import jax.numpy as jnp
from jax.experimental import pallas as pl
from jax.experimental.pallas import tpu as pltpu

BN_EPS = 1e-5
MM_DTYPE = jnp.bfloat16          # MXU operand dtype (accumulation stays f32)
VMEM_LIMIT = 32 * 1024 * 1024    # fits v5e/v6e/v7x scoped VMEM with headroom


# ----------------------------- Pallas kernels ------------------------------ #

def _conv1_stats_kernel(x_ref, w_ref, b_ref, m_ref, y_ref, s_ref, *, Wp):
    """3x3 conv (input pre-padded) + bias, in-kernel im2col as 9 shifted matmuls.

    Layout: channels on sublanes, flattened spatial on lanes (lane-dense).
    Also emits per-image masked per-channel sum / sum-of-squares for BatchNorm.
    """
    HoWp = y_ref.shape[2]                       # Ho * Wp flattened output positions
    acc = jnp.zeros((w_ref.shape[1], HoWp), jnp.float32)
    for t in range(9):                          # unrolled taps (dy, dx)
        dy, dx = t // 3, t % 3
        shift = dy * Wp + dx
        x_tap = x_ref[0, :, pl.ds(shift, HoWp)].astype(MM_DTYPE)   # (Cin, HoWp)
        acc += jnp.dot(w_ref[t], x_tap, preferred_element_type=jnp.float32)
    acc += b_ref[...]                           # (Cout, 1) broadcast along lanes
    y_ref[0] = acc                              # raw conv+bias for pass 2

    valid = acc * m_ref[...]                    # zero the wrap (garbage) columns
    s1 = jnp.sum(valid, axis=1, keepdims=True)          # (Cout, 1)
    s2 = jnp.sum(valid * valid, axis=1, keepdims=True)  # (Cout, 1)
    s_ref[0] = jnp.concatenate([s1, s2], axis=1)         # (Cout, 2)


def _bn_relu_down_kernel(y_ref, ss_ref, w2_ref, b2_ref, sel_ref, g_ref,
                         x_ref, d_ref):
    """Fused BatchNorm(global stats) + ReLU + 2x2/stride-2 down conv."""
    y = y_ref[0]                                 # (Cout, Ho*Wp) f32 raw conv+bias
    ss = ss_ref[...]                             # (Cout, 2) packed [scale, shift]
    ya = jnp.maximum(y * ss[:, 0:1] + ss[:, 1:2], 0.0)    # BN + ReLU, f32

    # lane-dense compaction of valid columns -> NCHW-flat ConvBlock output (exact f32)
    x_ref[0] = jnp.dot(ya, sel_ref[...], preferred_element_type=jnp.float32)

    # down conv: per tap, stride-2 gather on the MXU (y @ one-hot), then channel mix
    ya_c = ya.astype(MM_DTYPE)
    acc = jnp.zeros((d_ref.shape[1], d_ref.shape[2]), jnp.float32)
    for t in range(4):                           # unrolled taps (dy, dx)
        gathered = jnp.dot(ya_c, g_ref[t], preferred_element_type=jnp.float32)
        acc += jnp.dot(w2_ref[t], gathered.astype(MM_DTYPE),
                       preferred_element_type=jnp.float32)
    d_ref[0] = acc + b2_ref[...]                 # (Cout, Hd*Wd) + (Cout, 1)


# ------------------------------ forward wrapper ----------------------------- #

def encoder_block_forward(x_nchw, params):
    """x_nchw: (N, Cin, H, W) float32 -> (x, x_down) in NCHW like PyTorch."""
    w1, b1, gamma, beta, w2, b2 = (
        params["w1"], params["b1"], params["gamma"], params["beta"],
        params["w2"], params["b2"],
    )
    N, Cin, H, W = x_nchw.shape
    Cout = w1.shape[-1]

    PAD = 2
    Hp, Wp = H + 2 * PAD, W + 2 * PAD
    Ho, Wo = Hp - 2, Wp - 2                      # = H+2, W+2 (3x3 valid on padded)
    Hd, Wd = Ho // 2, Wo // 2
    HoWp, HoWo, HdWd = Ho * Wp, Ho * Wo, Hd * Wd
    XTRA = 2 * Wp + 2                            # tail zeros so every tap slice is in-bounds
    Lp = Hp * Wp + XTRA

    # ---- layout prep (cheap reshapes / compile-time constants; no NCHW<->NHWC) ----
    x_pad = jnp.pad(x_nchw, ((0, 0), (0, 0), (PAD, PAD), (PAD, PAD)))
    x_flat = jnp.pad(x_pad.reshape(N, Cin, Hp * Wp), ((0, 0), (0, 0), (0, XTRA)))

    w1t = jnp.stack([w1[t // 3, t % 3].T for t in range(9)]).astype(MM_DTYPE)  # (9,Cout,Cin)
    col = jnp.arange(HoWp)
    valid_mask = ((col % Wp) < Wo).astype(jnp.float32).reshape(1, HoWp)

    # ---------------- pass 1: conv 3x3 + bias + per-image BN partial sums ----------
    # TODO(synk): for large H*W, add a row-strip grid axis (with a 2-row halo) and
    # replace the one-hot gather matmuls with strip-local slicing; whole-image-per-
    # grid-step only scales to moderate spatial sizes.
    kernel1 = functools.partial(_conv1_stats_kernel, Wp=Wp)
    y_raw, stats = pl.pallas_call(
        kernel1,
        grid=(N,),
        in_specs=[
            pl.BlockSpec((1, Cin, Lp), lambda b: (b, 0, 0)),       # padded image (flat)
            pl.BlockSpec((9, Cout, Cin), lambda b: (0, 0, 0)),     # tap weights (bf16)
            pl.BlockSpec((Cout, 1), lambda b: (0, 0)),             # conv bias
            pl.BlockSpec((1, HoWp), lambda b: (0, 0)),             # valid-column mask
        ],
        out_specs=[
            pl.BlockSpec((1, Cout, HoWp), lambda b: (b, 0, 0)),    # raw conv+bias
            pl.BlockSpec((1, Cout, 2), lambda b: (b, 0, 0)),       # (sum, sum_sq)
        ],
        out_shape=[
            jax.ShapeDtypeStruct((N, Cout, HoWp), jnp.float32),
            jax.ShapeDtypeStruct((N, Cout, 2), jnp.float32),
        ],
        compiler_params=pltpu.CompilerParams(
            dimension_semantics=("parallel",),
            vmem_limit_bytes=VMEM_LIMIT),
    )(x_flat, w1t, b1.reshape(Cout, 1), valid_mask)

    # ---- global BatchNorm statistics (training mode: biased batch variance) -------
    tot = jnp.sum(stats, axis=0)                                   # (Cout, 2)
    cnt = float(N * Ho * Wo)
    mean = tot[:, 0] / cnt
    var = jnp.maximum(tot[:, 1] / cnt - mean * mean, 0.0)
    inv = jax.lax.rsqrt(var + BN_EPS)
    scale = gamma * inv
    shift = beta - mean * scale
    ss = jnp.stack([scale, shift], axis=1)                         # (Cout, 2) packed slab

    # constant selection / gather matrices (shape-only -> folded at compile time)
    g_flat = jnp.arange(HoWp)
    m_idx = jnp.arange(HoWo)
    sel = (g_flat[:, None] ==
           ((m_idx // Wo) * Wp + (m_idx % Wo))[None, :]).astype(jnp.float32)
    h_idx = jnp.arange(HdWd)
    gmats = []
    for t in range(4):
        dy, dx = t // 2, t % 2
        tgt = (2 * (h_idx // Wd) + dy) * Wp + (2 * (h_idx % Wd) + dx)
        gmats.append((g_flat[:, None] == tgt[None, :]).astype(MM_DTYPE))
    gmats = jnp.stack(gmats)                                       # (4, HoWp, HdWd)
    w2t = jnp.stack([w2[t // 2, t % 2].T for t in range(4)]).astype(MM_DTYPE)

    # ---------------- pass 2: fused BN-normalize + ReLU + down conv ----------------
    x_flat_out, d_flat = pl.pallas_call(
        _bn_relu_down_kernel,
        grid=(N,),
        in_specs=[
            pl.BlockSpec((1, Cout, HoWp), lambda b: (b, 0, 0)),    # raw conv+bias
            pl.BlockSpec((Cout, 2), lambda b: (0, 0)),             # packed scale/shift
            pl.BlockSpec((4, Cout, Cout), lambda b: (0, 0, 0)),    # down tap weights
            pl.BlockSpec((Cout, 1), lambda b: (0, 0)),             # down bias
            pl.BlockSpec((HoWp, HoWo), lambda b: (0, 0)),          # valid-col selector
            pl.BlockSpec((4, HoWp, HdWd), lambda b: (0, 0, 0)),    # stride-2 gathers
        ],
        out_specs=[
            pl.BlockSpec((1, Cout, HoWo), lambda b: (b, 0, 0)),
            pl.BlockSpec((1, Cout, HdWd), lambda b: (b, 0, 0)),
        ],
        out_shape=[
            jax.ShapeDtypeStruct((N, Cout, HoWo), jnp.float32),
            jax.ShapeDtypeStruct((N, Cout, HdWd), jnp.float32),
        ],
        compiler_params=pltpu.CompilerParams(
            dimension_semantics=("parallel",),
            vmem_limit_bytes=VMEM_LIMIT),
    )(y_raw, ss, w2t, b2.reshape(Cout, 1), sel, gmats)

    x_out = x_flat_out.reshape(N, Cout, Ho, Wo)       # free bitcast reshapes
    x_down = d_flat.reshape(N, Cout, Hd, Wd)
    return x_out, x_down


# ---------------------------- reference (pure JAX) --------------------------- #

def _reference_forward(x_nchw, params):
    w1 = jnp.transpose(params["w1"], (3, 2, 0, 1))    # (kh,kw,Cin,Cout) -> OIHW
    w2 = jnp.transpose(params["w2"], (3, 2, 0, 1))
    b1, gamma, beta, b2 = params["b1"], params["gamma"], params["beta"], params["b2"]

    y = jax.lax.conv_general_dilated(
        x_nchw, w1, (1, 1), [(2, 2), (2, 2)],
        dimension_numbers=("NCHW", "OIHW", "NCHW"))
    y = y + b1[None, :, None, None]
    m = jnp.mean(y, axis=(0, 2, 3), keepdims=True)
    v = jnp.mean((y - m) ** 2, axis=(0, 2, 3), keepdims=True)
    y = (y - m) / jnp.sqrt(v + BN_EPS) * gamma[None, :, None, None] + beta[None, :, None, None]
    y = jnp.maximum(y, 0.0)

    d = jax.lax.conv_general_dilated(
        y, w2, (2, 2), [(0, 0), (0, 0)],
        dimension_numbers=("NCHW", "OIHW", "NCHW"))
    d = d + b2[None, :, None, None]
    return y, d


# ---------------------------------- main ------------------------------------ #

def _init_params(key, in_channels, out_channels):
    k = jax.random.split(key, 6)
    s1 = 1.0 / jnp.sqrt(in_channels * 9.0)
    s2 = 1.0 / jnp.sqrt(out_channels * 4.0)
    return {
        # conv1 weights stored as (kh, kw, Cin, Cout)
        "w1": jax.random.uniform(k[0], (3, 3, in_channels, out_channels),
                                 jnp.float32, -s1, s1),
        "b1": jax.random.uniform(k[1], (out_channels,), jnp.float32, -s1, s1),
        "gamma": jnp.ones((out_channels,), jnp.float32),
        "beta": jnp.zeros((out_channels,), jnp.float32),
        # down conv weights stored as (kh, kw, Cout, Cout)
        "w2": jax.random.uniform(k[2], (2, 2, out_channels, out_channels),
                                 jnp.float32, -s2, s2),
        "b2": jax.random.uniform(k[3], (out_channels,), jnp.float32, -s2, s2),
    }


if __name__ == "__main__":
    key = jax.random.PRNGKey(0)
    kx, kp = jax.random.split(key)

    N, Cin, Cout, H, W = 2, 4, 8, 16, 16
    x = jax.random.normal(kx, (N, Cin, H, W), jnp.float32)
    params = _init_params(kp, Cin, Cout)

    x_out, x_down = jax.jit(encoder_block_forward)(x, params)
    jax.block_until_ready((x_out, x_down))

    assert x_out.shape == (N, Cout, H + 2, W + 2), x_out.shape
    assert x_down.shape == (N, Cout, (H + 2) // 2, (W + 2) // 2), x_down.shape

    ref_x, ref_d = _reference_forward(x, params)
    # bf16 MXU operands (f32 accumulation) => slightly looser tolerance than pure f32
    assert jnp.allclose(x_out, ref_x, rtol=2e-2, atol=2e-2)
    assert jnp.allclose(x_down, ref_d, rtol=2e-2, atol=2e-2)

    print("KERNEL_OK")
</pallas_src>

<mosaic_0001>
module attributes {stable_mosaic.version = 11 : i64} {
  func.func @_conv1_stats_kernel(%arg0: i32, %arg1: memref<1x4x442xf32, #tpu.memory_space<vmem>>, %arg2: memref<9x8x4xbf16, #tpu.memory_space<vmem>>, %arg3: memref<8x1xf32, #tpu.memory_space<vmem>>, %arg4: memref<1x360xf32, #tpu.memory_space<vmem>>, %arg5: memref<1x8x360xf32, #tpu.memory_space<vmem>>, %arg6: memref<1x8x2xf32, #tpu.memory_space<vmem>>) attributes {dimension_semantics = [#tpu.dimension_semantics<parallel>], iteration_bounds = array<i64: 2>, scalar_prefetch = 0 : i64, scratch_operands = 0 : i64, tpu.core_type = #tpu.core_type<tc>, window_params = [{transform_indices = @transform_0, window_bounds = array<i64: 1, 4, 442>}, {pipeline_mode = #tpu.pipeline_mode<synchronous>, transform_indices = @transform_1, window_bounds = array<i64: 9, 8, 4>}, {pipeline_mode = #tpu.pipeline_mode<synchronous>, transform_indices = @transform_2, window_bounds = array<i64: 8, 1>}, {pipeline_mode = #tpu.pipeline_mode<synchronous>, transform_indices = @transform_3, window_bounds = array<i64: 1, 360>}, {transform_indices = @transform_4, window_bounds = array<i64: 1, 8, 360>}, {transform_indices = @transform_5, window_bounds = array<i64: 1, 8, 2>}]} {
    %cst = arith.constant 0.000000e+00 : f32
    %0 = vector.broadcast %cst : f32 to vector<8x360xf32>
    %c0 = arith.constant 0 : index
    %c0_0 = arith.constant 0 : index
    %c0_1 = arith.constant 0 : index
    %1 = vector.load %arg1[%c0, %c0_0, %c0_1] : memref<1x4x442xf32, #tpu.memory_space<vmem>>, vector<1x4x360xf32>
    %2 = vector.shape_cast %1 : vector<1x4x360xf32> to vector<4x360xf32>
    %3 = arith.truncf %2 : vector<4x360xf32> to vector<4x360xbf16>
    %c0_2 = arith.constant 0 : index
    %c0_3 = arith.constant 0 : index
    %c0_4 = arith.constant 0 : index
    %4 = vector.load %arg2[%c0_2, %c0_3, %c0_4] : memref<9x8x4xbf16, #tpu.memory_space<vmem>>, vector<1x8x4xbf16>
    %5 = vector.shape_cast %4 : vector<1x8x4xbf16> to vector<8x4xbf16>
    %cst_5 = arith.constant dense<0.000000e+00> : vector<8x360xf32>
    %6 = tpu.matmul %5, %3, %cst_5 {dimension_numbers = #tpu.dot_dimension_numbers<[1], [0], [0], [1], [0, 0, 1, 1], [], []>} : vector<8x4xbf16>, vector<4x360xbf16>, vector<8x360xf32> -> vector<8x360xf32>
    %7 = arith.addf %0, %6 : vector<8x360xf32>
    %c0_6 = arith.constant 0 : index
    %c0_7 = arith.constant 0 : index
    %c1 = arith.constant 1 : index
    %8 = vector.load %arg1[%c0_6, %c0_7, %c1] : memref<1x4x442xf32, #tpu.memory_space<vmem>>, vector<1x4x360xf32>
    %9 = vector.shape_cast %8 : vector<1x4x360xf32> to vector<4x360xf32>
    %10 = arith.truncf %9 : vector<4x360xf32> to vector<4x360xbf16>
    %c1_8 = arith.constant 1 : index
    %c0_9 = arith.constant 0 : index
    %c0_10 = arith.constant 0 : index
    %11 = vector.load %arg2[%c1_8, %c0_9, %c0_10] : memref<9x8x4xbf16, #tpu.memory_space<vmem>>, vector<1x8x4xbf16>
    %12 = vector.shape_cast %11 : vector<1x8x4xbf16> to vector<8x4xbf16>
    %cst_11 = arith.constant dense<0.000000e+00> : vector<8x360xf32>
    %13 = tpu.matmul %12, %10, %cst_11 {dimension_numbers = #tpu.dot_dimension_numbers<[1], [0], [0], [1], [0, 0, 1, 1], [], []>} : vector<8x4xbf16>, vector<4x360xbf16>, vector<8x360xf32> -> vector<8x360xf32>
    %14 = arith.addf %7, %13 : vector<8x360xf32>
    %c0_12 = arith.constant 0 : index
    %c0_13 = arith.constant 0 : index
    %c2 = arith.constant 2 : index
    %15 = vector.load %arg1[%c0_12, %c0_13, %c2] : memref<1x4x442xf32, #tpu.memory_space<vmem>>, vector<1x4x360xf32>
    %16 = vector.shape_cast %15 : vector<1x4x360xf32> to vector<4x360xf32>
    %17 = arith.truncf %16 : vector<4x360xf32> to vector<4x360xbf16>
    %c2_14 = arith.constant 2 : index
    %c0_15 = arith.constant 0 : index
    %c0_16 = arith.constant 0 : index
    %18 = vector.load %arg2[%c2_14, %c0_15, %c0_16] : memref<9x8x4xbf16, #tpu.memory_space<vmem>>, vector<1x8x4xbf16>
    %19 = vector.shape_cast %18 : vector<1x8x4xbf16> to vector<8x4xbf16>
    %cst_17 = arith.constant dense<0.000000e+00> : vector<8x360xf32>
    %20 = tpu.matmul %19, %17, %cst_17 {dimension_numbers = #tpu.dot_dimension_numbers<[1], [0], [0], [1], [0, 0, 1, 1], [], []>} : vector<8x4xbf16>, vector<4x360xbf16>, vector<8x360xf32> -> vector<8x360xf32>
    %21 = arith.addf %14, %20 : vector<8x360xf32>
    %c0_18 = arith.constant 0 : index
    %c0_19 = arith.constant 0 : index
    %c20 = arith.constant 20 : index
    %22 = vector.load %arg1[%c0_18, %c0_19, %c20] : memref<1x4x442xf32, #tpu.memory_space<vmem>>, vector<1x4x360xf32>
    %23 = vector.shape_cast %22 : vector<1x4x360xf32> to vector<4x360xf32>
    %24 = arith.truncf %23 : vector<4x360xf32> to vector<4x360xbf16>
    %c3 = arith.constant 3 : index
    %c0_20 = arith.constant 0 : index
    %c0_21 = arith.constant 0 : index
    %25 = vector.load %arg2[%c3, %c0_20, %c0_21] : memref<9x8x4xbf16, #tpu.memory_space<vmem>>, vector<1x8x4xbf16>
    %26 = vector.shape_cast %25 : vector<1x8x4xbf16> to vector<8x4xbf16>
    %cst_22 = arith.constant dense<0.000000e+00> : vector<8x360xf32>
    %27 = tpu.matmul %26, %24, %cst_22 {dimension_numbers = #tpu.dot_dimension_numbers<[1], [0], [0], [1], [0, 0, 1, 1], [], []>} : vector<8x4xbf16>, vector<4x360xbf16>, vector<8x360xf32> -> vector<8x360xf32>
    %28 = arith.addf %21, %27 : vector<8x360xf32>
    %c0_23 = arith.constant 0 : index
    %c0_24 = arith.constant 0 : index
    %c21 = arith.constant 21 : index
    %29 = vector.load %arg1[%c0_23, %c0_24, %c21] : memref<1x4x442xf32, #tpu.memory_space<vmem>>, vector<1x4x360xf32>
    %30 = vector.shape_cast %29 : vector<1x4x360xf32> to vector<4x360xf32>
    %31 = arith.truncf %30 : vector<4x360xf32> to vector<4x360xbf16>
    %c4 = arith.constant 4 : index
    %c0_25 = arith.constant 0 : index
    %c0_26 = arith.constant 0 : index
    %32 = vector.load %arg2[%c4, %c0_25, %c0_26] : memref<9x8x4xbf16, #tpu.memory_space<vmem>>, vector<1x8x4xbf16>
    %33 = vector.shape_cast %32 : vector<1x8x4xbf16> to vector<8x4xbf16>
    %cst_27 = arith.constant dense<0.000000e+00> : vector<8x360xf32>
    %34 = tpu.matmul %33, %31, %cst_27 {dimension_numbers = #tpu.dot_dimension_numbers<[1], [0], [0], [1], [0, 0, 1, 1], [], []>} : vector<8x4xbf16>, vector<4x360xbf16>, vector<8x360xf32> -> vector<8x360xf32>
    %35 = arith.addf %28, %34 : vector<8x360xf32>
    %c0_28 = arith.constant 0 : index
    %c0_29 = arith.constant 0 : index
    %c22 = arith.constant 22 : index
    %36 = vector.load %arg1[%c0_28, %c0_29, %c22] : memref<1x4x442xf32, #tpu.memory_space<vmem>>, vector<1x4x360xf32>
    %37 = vector.shape_cast %36 : vector<1x4x360xf32> to vector<4x360xf32>
    %38 = arith.truncf %37 : vector<4x360xf32> to vector<4x360xbf16>
    %c5 = arith.constant 5 : index
    %c0_30 = arith.constant 0 : index
    %c0_31 = arith.constant 0 : index
    %39 = vector.load %arg2[%c5, %c0_30, %c0_31] : memref<9x8x4xbf16, #tpu.memory_space<vmem>>, vector<1x8x4xbf16>
    %40 = vector.shape_cast %39 : vector<1x8x4xbf16> to vector<8x4xbf16>
    %cst_32 = arith.constant dense<0.000000e+00> : vector<8x360xf32>
    %41 = tpu.matmul %40, %38, %cst_32 {dimension_numbers = #tpu.dot_dimension_numbers<[1], [0], [0], [1], [0, 0, 1, 1], [], []>} : vector<8x4xbf16>, vector<4x360xbf16>, vector<8x360xf32> -> vector<8x360xf32>
    %42 = arith.addf %35, %41 : vector<8x360xf32>
    %c0_33 = arith.constant 0 : index
    %c0_34 = arith.constant 0 : index
    %c40 = arith.constant 40 : index
    %43 = vector.load %arg1[%c0_33, %c0_34, %c40] : memref<1x4x442xf32, #tpu.memory_space<vmem>>, vector<1x4x360xf32>
    %44 = vector.shape_cast %43 : vector<1x4x360xf32> to vector<4x360xf32>
    %45 = arith.truncf %44 : vector<4x360xf32> to vector<4x360xbf16>
    %c6 = arith.constant 6 : index
    %c0_35 = arith.constant 0 : index
    %c0_36 = arith.constant 0 : index
    %46 = vector.load %arg2[%c6, %c0_35, %c0_36] : memref<9x8x4xbf16, #tpu.memory_space<vmem>>, vector<1x8x4xbf16>
    %47 = vector.shape_cast %46 : vector<1x8x4xbf16> to vector<8x4xbf16>
    %cst_37 = arith.constant dense<0.000000e+00> : vector<8x360xf32>
    %48 = tpu.matmul %47, %45, %cst_37 {dimension_numbers = #tpu.dot_dimension_numbers<[1], [0], [0], [1], [0, 0, 1, 1], [], []>} : vector<8x4xbf16>, vector<4x360xbf16>, vector<8x360xf32> -> vector<8x360xf32>
    %49 = arith.addf %42, %48 : vector<8x360xf32>
    %c0_38 = arith.constant 0 : index
    %c0_39 = arith.constant 0 : index
    %c41 = arith.constant 41 : index
    %50 = vector.load %arg1[%c0_38, %c0_39, %c41] : memref<1x4x442xf32, #tpu.memory_space<vmem>>, vector<1x4x360xf32>
    %51 = vector.shape_cast %50 : vector<1x4x360xf32> to vector<4x360xf32>
    %52 = arith.truncf %51 : vector<4x360xf32> to vector<4x360xbf16>
    %c7 = arith.constant 7 : index
    %c0_40 = arith.constant 0 : index
    %c0_41 = arith.constant 0 : index
    %53 = vector.load %arg2[%c7, %c0_40, %c0_41] : memref<9x8x4xbf16, #tpu.memory_space<vmem>>, vector<1x8x4xbf16>
    %54 = vector.shape_cast %53 : vector<1x8x4xbf16> to vector<8x4xbf16>
    %cst_42 = arith.constant dense<0.000000e+00> : vector<8x360xf32>
    %55 = tpu.matmul %54, %52, %cst_42 {dimension_numbers = #tpu.dot_dimension_numbers<[1], [0], [0], [1], [0, 0, 1, 1], [], []>} : vector<8x4xbf16>, vector<4x360xbf16>, vector<8x360xf32> -> vector<8x360xf32>
    %56 = arith.addf %49, %55 : vector<8x360xf32>
    %c0_43 = arith.constant 0 : index
    %c0_44 = arith.constant 0 : index
    %c42 = arith.constant 42 : index
    %57 = vector.load %arg1[%c0_43, %c0_44, %c42] : memref<1x4x442xf32, #tpu.memory_space<vmem>>, vector<1x4x360xf32>
    %58 = vector.shape_cast %57 : vector<1x4x360xf32> to vector<4x360xf32>
    %59 = arith.truncf %58 : vector<4x360xf32> to vector<4x360xbf16>
    %c8 = arith.constant 8 : index
    %c0_45 = arith.constant 0 : index
    %c0_46 = arith.constant 0 : index
    %60 = vector.load %arg2[%c8, %c0_45, %c0_46] : memref<9x8x4xbf16, #tpu.memory_space<vmem>>, vector<1x8x4xbf16>
    %61 = vector.shape_cast %60 : vector<1x8x4xbf16> to vector<8x4xbf16>
    %cst_47 = arith.constant dense<0.000000e+00> : vector<8x360xf32>
    %62 = tpu.matmul %61, %59, %cst_47 {dimension_numbers = #tpu.dot_dimension_numbers<[1], [0], [0], [1], [0, 0, 1, 1], [], []>} : vector<8x4xbf16>, vector<4x360xbf16>, vector<8x360xf32> -> vector<8x360xf32>
    %63 = arith.addf %56, %62 : vector<8x360xf32>
    %c0_48 = arith.constant 0 : index
    %c0_49 = arith.constant 0 : index
    %64 = vector.load %arg3[%c0_48, %c0_49] : memref<8x1xf32, #tpu.memory_space<vmem>>, vector<8x1xf32>
    %65 = vector.broadcast %64 : vector<8x1xf32> to vector<8x360xf32>
    %66 = arith.addf %63, %65 : vector<8x360xf32>
    %c0_50 = arith.constant 0 : index
    %c0_51 = arith.constant 0 : index
    %c0_52 = arith.constant 0 : index
    %67 = vector.load %arg5[%c0_50, %c0_51, %c0_52] : memref<1x8x360xf32, #tpu.memory_space<vmem>>, vector<1x8x360xf32>
    %68 = vector.shape_cast %67 : vector<1x8x360xf32> to vector<8x360xf32>
    %69 = vector.shape_cast %66 : vector<8x360xf32> to vector<1x8x360xf32>
    tpu.vector_store %arg5[%c0_50, %c0_51, %c0_52], %69 {strides = array<i32>} : memref<1x8x360xf32, #tpu.memory_space<vmem>>, vector<1x8x360xf32>,
    %c0_53 = arith.constant 0 : index
    %c0_54 = arith.constant 0 : index
    %70 = vector.load %arg4[%c0_53, %c0_54] : memref<1x360xf32, #tpu.memory_space<vmem>>, vector<1x360xf32>
    %71 = vector.broadcast %70 : vector<1x360xf32> to vector<8x360xf32>
    %72 = arith.mulf %66, %71 : vector<8x360xf32>
    %cst_55 = arith.constant dense<0.000000e+00> : vector<8xf32>
    %73 = vector.multi_reduction <add>, %72, %cst_55 [1] : vector<8x360xf32> to vector<8xf32>
    %74 = vector.shape_cast %73 : vector<8xf32> to vector<8x1xf32>
    %75 = arith.mulf %72, %72 : vector<8x360xf32>
    %cst_56 = arith.constant dense<0.000000e+00> : vector<8xf32>
    %76 = vector.multi_reduction <add>, %75, %cst_56 [1] : vector<8x360xf32> to vector<8xf32>
    %77 = vector.shape_cast %76 : vector<8xf32> to vector<8x1xf32>
    %78 = tpu.concatenate %74, %77 in 1 : vector<8x1xf32>, vector<8x1xf32> -> vector<8x2xf32>
    %c0_57 = arith.constant 0 : index
    %c0_58 = arith.constant 0 : index
    %c0_59 = arith.constant 0 : index
    %79 = vector.load %arg6[%c0_57, %c0_58, %c0_59] : memref<1x8x2xf32, #tpu.memory_space<vmem>>, vector<1x8x2xf32>
    %80 = vector.shape_cast %79 : vector<1x8x2xf32> to vector<8x2xf32>
    %81 = vector.shape_cast %78 : vector<8x2xf32> to vector<1x8x2xf32>
    tpu.vector_store %arg6[%c0_57, %c0_58, %c0_59], %81 {strides = array<i32>} : memref<1x8x2xf32, #tpu.memory_space<vmem>>, vector<1x8x2xf32>,
    return
  }
  func.func @transform_0(%arg0: i32) -> (i32, i32, i32) {
    %c0_i32 = arith.constant 0 : i32
    %c0_i32_0 = arith.constant 0 : i32
    %c0_i32_1 = arith.constant 0 : i32
    return %arg0, %c0_i32, %c0_i32_0 : i32, i32, i32
  }
  func.func @transform_1(%arg0: i32) -> (i32, i32, i32) {
    %c0_i32 = arith.constant 0 : i32
    %c0_i32_0 = arith.constant 0 : i32
    %c0_i32_1 = arith.constant 0 : i32
    %c0_i32_2 = arith.constant 0 : i32
    return %c0_i32, %c0_i32_0, %c0_i32_1 : i32, i32, i32
  }
  func.func @transform_2(%arg0: i32) -> (i32, i32) {
    %c0_i32 = arith.constant 0 : i32
    %c0_i32_0 = arith.constant 0 : i32
    %c0_i32_1 = arith.constant 0 : i32
    return %c0_i32, %c0_i32_0 : i32, i32
  }
  func.func @transform_3(%arg0: i32) -> (i32, i32) {
    %c0_i32 = arith.constant 0 : i32
    %c0_i32_0 = arith.constant 0 : i32
    %c0_i32_1 = arith.constant 0 : i32
    return %c0_i32, %c0_i32_0 : i32, i32
  }
  func.func @transform_4(%arg0: i32) -> (i32, i32, i32) {
    %c0_i32 = arith.constant 0 : i32
    %c0_i32_0 = arith.constant 0 : i32
    %c0_i32_1 = arith.constant 0 : i32
    return %arg0, %c0_i32, %c0_i32_0 : i32, i32, i32
  }
  func.func @transform_5(%arg0: i32) -> (i32, i32, i32) {
    %c0_i32 = arith.constant 0 : i32
    %c0_i32_0 = arith.constant 0 : i32
    %c0_i32_1 = arith.constant 0 : i32
    return %arg0, %c0_i32, %c0_i32_0 : i32, i32, i32
  }
}

module attributes {stable_mosaic.version = 11 : i64} {
  func.func @_bn_relu_down_kernel(%arg0: i32, %arg1: memref<1x8x360xf32, #tpu.memory_space<vmem>>, %arg2: memref<8x2xf32, #tpu.memory_space<vmem>>, %arg3: memref<4x8x8xbf16, #tpu.memory_space<vmem>>, %arg4: memref<8x1xf32, #tpu.memory_space<vmem>>, %arg5: memref<360x324xf32, #tpu.memory_space<vmem>>, %arg6: memref<4x360x81xbf16, #tpu.memory_space<vmem>>, %arg7: memref<1x8x324xf32, #tpu.memory_space<vmem>>, %arg8: memref<1x8x81xf32, #tpu.memory_space<vmem>>) attributes {dimension_semantics = [#tpu.dimension_semantics<parallel>], iteration_bounds = array<i64: 2>, scalar_prefetch = 0 : i64, scratch_operands = 0 : i64, tpu.core_type = #tpu.core_type<tc>, window_params = [{transform_indices = @transform_0, window_bounds = array<i64: 1, 8, 360>}, {pipeline_mode = #tpu.pipeline_mode<synchronous>, transform_indices = @transform_1, window_bounds = array<i64: 8, 2>}, {pipeline_mode = #tpu.pipeline_mode<synchronous>, transform_indices = @transform_2, window_bounds = array<i64: 4, 8, 8>}, {pipeline_mode = #tpu.pipeline_mode<synchronous>, transform_indices = @transform_3, window_bounds = array<i64: 8, 1>}, {pipeline_mode = #tpu.pipeline_mode<synchronous>, transform_indices = @transform_4, window_bounds = array<i64: 360, 324>}, {pipeline_mode = #tpu.pipeline_mode<synchronous>, transform_indices = @transform_5, window_bounds = array<i64: 4, 360, 81>}, {transform_indices = @transform_6, window_bounds = array<i64: 1, 8, 324>}, {transform_indices = @transform_7, window_bounds = array<i64: 1, 8, 81>}]} {
    %c0 = arith.constant 0 : index
    %c0_0 = arith.constant 0 : index
    %c0_1 = arith.constant 0 : index
    %0 = vector.load %arg1[%c0, %c0_0, %c0_1] : memref<1x8x360xf32, #tpu.memory_space<vmem>>, vector<1x8x360xf32>
    %1 = vector.shape_cast %0 : vector<1x8x360xf32> to vector<8x360xf32>
    %c0_2 = arith.constant 0 : index
    %c0_3 = arith.constant 0 : index
    %2 = vector.load %arg2[%c0_2, %c0_3] : memref<8x2xf32, #tpu.memory_space<vmem>>, vector<8x2xf32>
    %3 = vector.extract_strided_slice %2 {offsets = [0, 0], sizes = [8, 1], strides = [1, 1]} : vector<8x2xf32> to vector<8x1xf32>
    %4 = vector.broadcast %3 : vector<8x1xf32> to vector<8x360xf32>
    %5 = arith.mulf %1, %4 : vector<8x360xf32>
    %6 = vector.extract_strided_slice %2 {offsets = [0, 1], sizes = [8, 1], strides = [1, 1]} : vector<8x2xf32> to vector<8x1xf32>
    %7 = vector.broadcast %6 : vector<8x1xf32> to vector<8x360xf32>
    %8 = arith.addf %5, %7 : vector<8x360xf32>
    %cst = arith.constant 0.000000e+00 : f32
    %9 = vector.broadcast %cst : f32 to vector<8x360xf32>
    %10 = arith.maximumf %8, %9 : vector<8x360xf32>
    %c0_4 = arith.constant 0 : index
    %c0_5 = arith.constant 0 : index
    %11 = vector.load %arg5[%c0_4, %c0_5] : memref<360x324xf32, #tpu.memory_space<vmem>>, vector<360x324xf32>
    %cst_6 = arith.constant dense<0.000000e+00> : vector<8x324xf32>
    %12 = tpu.matmul %10, %11, %cst_6 {dimension_numbers = #tpu.dot_dimension_numbers<[1], [0], [0], [1], [0, 0, 1, 1], [], []>} : vector<8x360xf32>, vector<360x324xf32>, vector<8x324xf32> -> vector<8x324xf32>
    %c0_7 = arith.constant 0 : index
    %c0_8 = arith.constant 0 : index
    %c0_9 = arith.constant 0 : index
    %13 = vector.load %arg7[%c0_7, %c0_8, %c0_9] : memref<1x8x324xf32, #tpu.memory_space<vmem>>, vector<1x8x324xf32>
    %14 = vector.shape_cast %13 : vector<1x8x324xf32> to vector<8x324xf32>
    %15 = vector.shape_cast %12 : vector<8x324xf32> to vector<1x8x324xf32>
    tpu.vector_store %arg7[%c0_7, %c0_8, %c0_9], %15 {strides = array<i32>} : memref<1x8x324xf32, #tpu.memory_space<vmem>>, vector<1x8x324xf32>,
    %16 = arith.truncf %10 : vector<8x360xf32> to vector<8x360xbf16>
    %cst_10 = arith.constant 0.000000e+00 : f32
    %17 = vector.broadcast %cst_10 : f32 to vector<8x81xf32>
    %c0_11 = arith.constant 0 : index
    %c0_12 = arith.constant 0 : index
    %c0_13 = arith.constant 0 : index
    %18 = vector.load %arg6[%c0_11, %c0_12, %c0_13] : memref<4x360x81xbf16, #tpu.memory_space<vmem>>, vector<1x360x81xbf16>
    %19 = vector.shape_cast %18 : vector<1x360x81xbf16> to vector<360x81xbf16>
    %cst_14 = arith.constant dense<0.000000e+00> : vector<8x81xf32>
    %20 = tpu.matmul %16, %19, %cst_14 {dimension_numbers = #tpu.dot_dimension_numbers<[1], [0], [0], [1], [0, 0, 1, 1], [], []>} : vector<8x360xbf16>, vector<360x81xbf16>, vector<8x81xf32> -> vector<8x81xf32>
    %c0_15 = arith.constant 0 : index
    %c0_16 = arith.constant 0 : index
    %c0_17 = arith.constant 0 : index
    %21 = vector.load %arg3[%c0_15, %c0_16, %c0_17] : memref<4x8x8xbf16, #tpu.memory_space<vmem>>, vector<1x8x8xbf16>
    %22 = vector.shape_cast %21 : vector<1x8x8xbf16> to vector<8x8xbf16>
    %23 = arith.truncf %20 : vector<8x81xf32> to vector<8x81xbf16>
    %cst_18 = arith.constant dense<0.000000e+00> : vector<8x81xf32>
    %24 = tpu.matmul %22, %23, %cst_18 {dimension_numbers = #tpu.dot_dimension_numbers<[1], [0], [0], [1], [0, 0, 1, 1], [], []>} : vector<8x8xbf16>, vector<8x81xbf16>, vector<8x81xf32> -> vector<8x81xf32>
    %25 = arith.addf %17, %24 : vector<8x81xf32>
    %c1 = arith.constant 1 : index
    %c0_19 = arith.constant 0 : index
    %c0_20 = arith.constant 0 : index
    %26 = vector.load %arg6[%c1, %c0_19, %c0_20] : memref<4x360x81xbf16, #tpu.memory_space<vmem>>, vector<1x360x81xbf16>
    %27 = vector.shape_cast %26 : vector<1x360x81xbf16> to vector<360x81xbf16>
    %cst_21 = arith.constant dense<0.000000e+00> : vector<8x81xf32>
    %28 = tpu.matmul %16, %27, %cst_21 {dimension_numbers = #tpu.dot_dimension_numbers<[1], [0], [0], [1], [0, 0, 1, 1], [], []>} : vector<8x360xbf16>, vector<360x81xbf16>, vector<8x81xf32> -> vector<8x81xf32>
    %c1_22 = arith.constant 1 : index
    %c0_23 = arith.constant 0 : index
    %c0_24 = arith.constant 0 : index
    %29 = vector.load %arg3[%c1_22, %c0_23, %c0_24] : memref<4x8x8xbf16, #tpu.memory_space<vmem>>, vector<1x8x8xbf16>
    %30 = vector.shape_cast %29 : vector<1x8x8xbf16> to vector<8x8xbf16>
    %31 = arith.truncf %28 : vector<8x81xf32> to vector<8x81xbf16>
    %cst_25 = arith.constant dense<0.000000e+00> : vector<8x81xf32>
    %32 = tpu.matmul %30, %31, %cst_25 {dimension_numbers = #tpu.dot_dimension_numbers<[1], [0], [0], [1], [0, 0, 1, 1], [], []>} : vector<8x8xbf16>, vector<8x81xbf16>, vector<8x81xf32> -> vector<8x81xf32>
    %33 = arith.addf %25, %32 : vector<8x81xf32>
    %c2 = arith.constant 2 : index
    %c0_26 = arith.constant 0 : index
    %c0_27 = arith.constant 0 : index
    %34 = vector.load %arg6[%c2, %c0_26, %c0_27] : memref<4x360x81xbf16, #tpu.memory_space<vmem>>, vector<1x360x81xbf16>
    %35 = vector.shape_cast %34 : vector<1x360x81xbf16> to vector<360x81xbf16>
    %cst_28 = arith.constant dense<0.000000e+00> : vector<8x81xf32>
    %36 = tpu.matmul %16, %35, %cst_28 {dimension_numbers = #tpu.dot_dimension_numbers<[1], [0], [0], [1], [0, 0, 1, 1], [], []>} : vector<8x360xbf16>, vector<360x81xbf16>, vector<8x81xf32> -> vector<8x81xf32>
    %c2_29 = arith.constant 2 : index
    %c0_30 = arith.constant 0 : index
    %c0_31 = arith.constant 0 : index
    %37 = vector.load %arg3[%c2_29, %c0_30, %c0_31] : memref<4x8x8xbf16, #tpu.memory_space<vmem>>, vector<1x8x8xbf16>
    %38 = vector.shape_cast %37 : vector<1x8x8xbf16> to vector<8x8xbf16>
    %39 = arith.truncf %36 : vector<8x81xf32> to vector<8x81xbf16>
    %cst_32 = arith.constant dense<0.000000e+00> : vector<8x81xf32>
    %40 = tpu.matmul %38, %39, %cst_32 {dimension_numbers = #tpu.dot_dimension_numbers<[1], [0], [0], [1], [0, 0, 1, 1], [], []>} : vector<8x8xbf16>, vector<8x81xbf16>, vector<8x81xf32> -> vector<8x81xf32>
    %41 = arith.addf %33, %40 : vector<8x81xf32>
    %c3 = arith.constant 3 : index
    %c0_33 = arith.constant 0 : index
    %c0_34 = arith.constant 0 : index
    %42 = vector.load %arg6[%c3, %c0_33, %c0_34] : memref<4x360x81xbf16, #tpu.memory_space<vmem>>, vector<1x360x81xbf16>
    %43 = vector.shape_cast %42 : vector<1x360x81xbf16> to vector<360x81xbf16>
    %cst_35 = arith.constant dense<0.000000e+00> : vector<8x81xf32>
    %44 = tpu.matmul %16, %43, %cst_35 {dimension_numbers = #tpu.dot_dimension_numbers<[1], [0], [0], [1], [0, 0, 1, 1], [], []>} : vector<8x360xbf16>, vector<360x81xbf16>, vector<8x81xf32> -> vector<8x81xf32>
    %c3_36 = arith.constant 3 : index
    %c0_37 = arith.constant 0 : index
    %c0_38 = arith.constant 0 : index
    %45 = vector.load %arg3[%c3_36, %c0_37, %c0_38] : memref<4x8x8xbf16, #tpu.memory_space<vmem>>, vector<1x8x8xbf16>
    %46 = vector.shape_cast %45 : vector<1x8x8xbf16> to vector<8x8xbf16>
    %47 = arith.truncf %44 : vector<8x81xf32> to vector<8x81xbf16>
    %cst_39 = arith.constant dense<0.000000e+00> : vector<8x81xf32>
    %48 = tpu.matmul %46, %47, %cst_39 {dimension_numbers = #tpu.dot_dimension_numbers<[1], [0], [0], [1], [0, 0, 1, 1], [], []>} : vector<8x8xbf16>, vector<8x81xbf16>, vector<8x81xf32> -> vector<8x81xf32>
    %49 = arith.addf %41, %48 : vector<8x81xf32>
    %c0_40 = arith.constant 0 : index
    %c0_41 = arith.constant 0 : index
    %50 = vector.load %arg4[%c0_40, %c0_41] : memref<8x1xf32, #tpu.memory_space<vmem>>, vector<8x1xf32>
    %51 = vector.broadcast %50 : vector<8x1xf32> to vector<8x81xf32>
    %52 = arith.addf %49, %51 : vector<8x81xf32>
    %c0_42 = arith.constant 0 : index
    %c0_43 = arith.constant 0 : index
    %c0_44 = arith.constant 0 : index
    %53 = vector.load %arg8[%c0_42, %c0_43, %c0_44] : memref<1x8x81xf32, #tpu.memory_space<vmem>>, vector<1x8x81xf32>
    %54 = vector.shape_cast %53 : vector<1x8x81xf32> to vector<8x81xf32>
    %55 = vector.shape_cast %52 : vector<8x81xf32> to vector<1x8x81xf32>
    tpu.vector_store %arg8[%c0_42, %c0_43, %c0_44], %55 {strides = array<i32>} : memref<1x8x81xf32, #tpu.memory_space<vmem>>, vector<1x8x81xf32>,
    return
  }
  func.func @transform_0(%arg0: i32) -> (i32, i32, i32) {
    %c0_i32 = arith.constant 0 : i32
    %c0_i32_0 = arith.constant 0 : i32
    %c0_i32_1 = arith.constant 0 : i32
    return %arg0, %c0_i32, %c0_i32_0 : i32, i32, i32
  }
  func.func @transform_1(%arg0: i32) -> (i32, i32) {
    %c0_i32 = arith.constant 0 : i32
    %c0_i32_0 = arith.constant 0 : i32
    %c0_i32_1 = arith.constant 0 : i32
    return %c0_i32, %c0_i32_0 : i32, i32
  }
  func.func @transform_2(%arg0: i32) -> (i32, i32, i32) {
    %c0_i32 = arith.constant 0 : i32
    %c0_i32_0 = arith.constant 0 : i32
    %c0_i32_1 = arith.constant 0 : i32
    %c0_i32_2 = arith.constant 0 : i32
    return %c0_i32, %c0_i32_0, %c0_i32_1 : i32, i32, i32
  }
  func.func @transform_3(%arg0: i32) -> (i32, i32) {
    %c0_i32 = arith.constant 0 : i32
    %c0_i32_0 = arith.constant 0 : i32
    %c0_i32_1 = arith.constant 0 : i32
    return %c0_i32, %c0_i32_0 : i32, i32
  }
  func.func @transform_4(%arg0: i32) -> (i32, i32) {
    %c0_i32 = arith.constant 0 : i32
    %c0_i32_0 = arith.constant 0 : i32
    %c0_i32_1 = arith.constant 0 : i32
    return %c0_i32, %c0_i32_0 : i32, i32
  }
  func.func @transform_5(%arg0: i32) -> (i32, i32, i32) {
    %c0_i32 = arith.constant 0 : i32
    %c0_i32_0 = arith.constant 0 : i32
    %c0_i32_1 = arith.constant 0 : i32
    %c0_i32_2 = arith.constant 0 : i32
    return %c0_i32, %c0_i32_0, %c0_i32_1 : i32, i32, i32
  }
  func.func @transform_6(%arg0: i32) -> (i32, i32, i32) {
    %c0_i32 = arith.constant 0 : i32
    %c0_i32_0 = arith.constant 0 : i32
    %c0_i32_1 = arith.constant 0 : i32
    return %arg0, %c0_i32, %c0_i32_0 : i32, i32, i32
  }
  func.func @transform_7(%arg0: i32) -> (i32, i32, i32) {
    %c0_i32 = arith.constant 0 : i32
    %c0_i32_0 = arith.constant 0 : i32
    %c0_i32_1 = arith.constant 0 : i32
    return %arg0, %c0_i32, %c0_i32_0 : i32, i32, i32
  }
}

</mosaic_0001>

<bundles_post_ra>
// kernel: encoder_block_forward.2
= control target key start
LH: loop header
LB: loop body
LE: loop exit
PB: predicated region body
PF: predicated region fallthrough
CT: control target
= control target key end

     0   :  { %s1237_s18 = smov 0   ;;  %s1405_s0 = inlined_call_operand.vmem [shape: f32[2,4,442], index: 0, kind: input, shape index: {}]   ;;  %s1406_s1 = inlined_call_operand.vmem [shape: bf16[9,8,4], index: 1, kind: input, shape index: {}]   ;;  %s1407_s2 = inlined_call_operand.vmem [shape: f32[8,1], index: 2, kind: input, shape index: {}]   ;;  %s1408_s3 = inlined_call_operand.vmem [shape: f32[1,360], index: 3, kind: input, shape index: {}]   ;;  %s1409_s4 = inlined_call_operand.vmem [shape: f32[2,8,360], index: 4, kind: output, shape index: {0}]   ;;  %s1410_s5 = inlined_call_operand.vmem [shape: f32[2,8,2], index: 5, kind: output, shape index: {1}]  }
   0x1 LB: > { %s1124_s19 = sadd.s32 4294967295, %s1196_s18   ;;  %p1128_p0 = scmp.ge.s32.totalorder %s1196_s18, 1  ;;  %s1196_s18 = sphi %s1237_s18, %s16_s18  }
   0x2   : > { %p190_p1 = scmp.lt.s32.totalorder %s1196_s18, 3 }
   0x4   : > { %p191_p2 = pnand %p1128_p0, %p190_p1 }
   0x5   : > { %p222_p3 = scmp.lt.s32.totalorder (!%p191_p2), %s1124_s19, 1  ;;  %s1198_s24 = smov (!%p191_p2), 127  }
   0x6   : > { %194 = sbr.rel (%p191_p2) target bundleno = 513 (0x201), region = 36  ;;  %s1199_s25 = smov (!%p191_p2), 126  }
   0x7   : > { %s1200_s26 = smov (!%p191_p2), 108   ;;  %s1201_s27 = smov (!%p191_p2), 107  }
   0x8   : > { %s1202_s28 = smov (!%p191_p2), 106   ;;  %s1203_s29 = smov (!%p191_p2), 88  }
   0x9   : > { %s1204_s30 = smov (!%p191_p2), 87   ;;  %s1205_s6 = smov (!%p191_p2), 86  }
   0xb   : > { %s1412_s19 = smov (!%p222_p3, %s1124_s19), 1  ;;  %vm288_vm0 = vcmask 1041408   ;;  %vm284_vm1 = vcmask 31744   ;;  %vm415_vm2 = vcmask 1031168   ;;  %vm281_vm3 = vcmask 1039360  }
   0xc   : > { %s1170_s20 = sshll.u32 %s1412_s19, 4  ;;  %vm499_vm4 = vcmask 883712   ;;  %vm583_vm5 = vcmask 875520   ;;  %vm667_vm6 = vcmask 867328   ;;  %vm757_vm7 = vcmask 719872   ;;  %s1132_s10 = sshll.u32 %s1412_s19, 3 }
   0xd   : > { %s1251_s23 = scalar_lea.vmem %s1405_s0, %s1170_s20  ;;  %vm848_vm8 = vcmask 711680   ;;  %vm939_vm9 = vcmask 703488   ;;  %vm1008_vm10 = vcmask 850944   ;;  %vm1034_vm11 = vcmask 7168   ;;  %s235_s13 = scalar_lea.vmem %s1410_s5, %s1132_s10 }
   0xe   : > { %v238_v0 = vld [vmem:[%s1251_s23 + $0x8] sm:$0xf]  ;;  %v1255_v1 = vld [vmem:[%s1251_s23] sm:$0xff]  ;;  %vm1036_vm12 = vcmask 15360  }
   0xf   : > { %243 = vst [vmem:[#allocation1 + $0x10] ss:$2 sm:$0xff] %v238_v0  ;;  %v255_v2 = vld [vmem:[%s1251_s23 + $0x8] sm:$0xf] }
  0x10   : > { %241 = vst [vmem:[#allocation1] ss:$2 sm:$0xff] %v1255_v1  ;;  %v389_v6 = vld [vmem:[%s1251_s23 + $0x8] sm:$0xf] }
  0x11   : > { %v473_v12 = vld [vmem:[%s1251_s23 + $0x8] sm:$0xf] }
  0x12   : > { %v557_v19 = vld [vmem:[%s1251_s23 + $0x8] sm:$0xf] }
  0x13   : > { %v641_v26 = vld [vmem:[%s1251_s23 + $0x8] sm:$0xf] }
  0x14   : > { %v725_v33 = vld [vmem:[%s1251_s23 + $0x8] sm:$0xff] }
  0x16   : > { %v1259_v3 = vld.sshfl [vmem:[#allocation1 + $0x10] sm:$0xff pattern:$0x75316420] }
  0x17   : > { %260 = vst [vmem:[#allocation1 + $0x10] ss:$2 sm:$0xff] %v255_v2  ;;  %v1261_v4 = vld.sshfl [vmem:[#allocation1] sm:$0xff pattern:$0x75316420] }
  0x18   : > { %v1263_v5 = vld.sshfl [vmem:[#allocation1 + $0x8] sm:$0xff pattern:$0x75316420] }
  0x19   : > { %258 = vst [vmem:[#allocation1] ss:$2 sm:$0xff] %v1255_v1 }
  0x1e   : > { %v263_v7 = vld.sshfl [vmem:[#allocation1 + $0x10] sm:$0xff pattern:$0x75316420] }
  0x1f   : > { %v269_v8 = vpack.c.bf16 %v263_v7, %v263_v7  ;;  %394 = vst [vmem:[#allocation1 + $0x10] ss:$2 sm:$0xff] %v389_v6  ;;  %v1284_v6 = vld [vmem:[%s1406_s1] sm:$0xf] }
  0x20   : > { %v262_v9 = vld.sshfl [vmem:[#allocation1 + $0x8] sm:$0xff pattern:$0x75316420]  ;;  %v261_v10 = vld.sshfl [vmem:[#allocation1] sm:$0xff pattern:$0x75316420] }
  0x21   : > { %279 = vrot.lane.b32.xlu0 %v269_v8, %s1198_s24  ;;  %v268_v11 = vpack.c.bf16 %v262_v9, %v262_v9  ;;  %392 = vst [vmem:[#allocation1] ss:$2 sm:$0xff] %v1255_v1  ;;  %v267_v13 = vpack.c.bf16 %v261_v10, %v261_v10  ;;  %v252_v10 = vpack.c.bf16 %v1259_v3, %v1259_v3 }
  0x23   : > { %277 = vrot.lane.b32.xlu1 %v268_v11, %s1198_s24 }
  0x26   : > { %v397_v14 = vld.sshfl [vmem:[#allocation1 + $0x10] sm:$0xff pattern:$0x75316420] }
  0x27   : > { %478 = vst [vmem:[#allocation1 + $0x10] ss:$2 sm:$0xff] %v473_v12  ;;  %v403_v24 = vpack.c.bf16 %v397_v14, %v397_v14  ;;  %v1295_v12 = vld [vmem:[%s1406_s1 + $0x8] sm:$0xf] }
  0x28   : > { %v395_v15 = vld.sshfl [vmem:[#allocation1] sm:$0xff pattern:$0x75316420]  ;;  %v396_v16 = vld.sshfl [vmem:[#allocation1 + $0x8] sm:$0xff pattern:$0x75316420] }
  0x29   : > { %v401_v17 = vpack.c.bf16 %v395_v15, %v395_v15  ;;  %275 = vrot.lane.b32.xlu0 %v267_v13, %s1198_s24  ;;  %v402_v18 = vpack.c.bf16 %v396_v16, %v396_v16  ;;  %476 = vst [vmem:[#allocation1] ss:$2 sm:$0xff] %v1255_v1  ;;  %v1133_v15 = vld [vmem:[%s1406_s1 + $0x4] sm:$0xf]  ;;  %v347_v16 = vsel %vm288_vm0, %v252_v10, 0 }
  0x2b   : > { %409 = vrot.lane.b32.xlu1 %v401_v17, %s1199_s25  ;;  %411 = vrot.lane.b32.xlu2 %v402_v18, %s1199_s25  ;;  %v251_v18 = vpack.c.bf16 %v1263_v5, %v1263_v5 }
  0x2e   : > { %v481_v20 = vld.sshfl [vmem:[#allocation1 + $0x10] sm:$0xff pattern:$0x75316420] }
  0x2f   : > { %v487_v21 = vpack.c.bf16 %v481_v20, %v481_v20  ;;  %562 = vst [vmem:[#allocation1 + $0x10] ss:$2 sm:$0xff] %v557_v19 }
  0x30   : > { %v479_v22 = vld.sshfl [vmem:[#allocation1] sm:$0xff pattern:$0x75316420]  ;;  %v480_v23 = vld.sshfl [vmem:[#allocation1 + $0x8] sm:$0xff pattern:$0x75316420] }
  0x31   : > { %v486_v25 = vpack.c.bf16 %v480_v23, %v480_v23  ;;  %560 = vst [vmem:[#allocation1] ss:$2 sm:$0xff] %v1255_v1  ;;  %v485_v31 = vpack.c.bf16 %v479_v22, %v479_v22 }
  0x33   : > { %497 = vrot.lane.b32.xlu1 %v487_v21, %s1200_s26  ;;  %495 = vrot.lane.b32.xlu0 %v486_v25, %s1200_s26  ;;  %v344_v21 = vsel %vm288_vm0, %v251_v18, 0 }
  0x34   : > { %413 = vrot.lane.b32.xlu2 %v403_v24, %s1199_s25 }
  0x36   : > { %v565_v27 = vld.sshfl [vmem:[#allocation1 + $0x10] sm:$0xff pattern:$0x75316420] }
  0x37   : > { %v571_v28 = vpack.c.bf16 %v565_v27, %v565_v27  ;;  %646 = vst [vmem:[#allocation1 + $0x10] ss:$2 sm:$0xff] %v641_v26 }
  0x38   : > { %v564_v29 = vld.sshfl [vmem:[#allocation1 + $0x8] sm:$0xff pattern:$0x75316420]  ;;  %v563_v30 = vld.sshfl [vmem:[#allocation1] sm:$0xff pattern:$0x75316420] }
  0x39   : > { %v569_v32 = vpack.c.bf16 %v563_v30, %v563_v30  ;;  %644 = vst [vmem:[#allocation1] ss:$2 sm:$0xff] %v1255_v1  ;;  %v570_v37 = vpack.c.bf16 %v564_v29, %v564_v29 }
  0x3b   : > { %577 = vrot.lane.b32.xlu1 %v569_v32, %s1201_s27  ;;  %581 = vrot.lane.b32.xlu0 %v571_v28, %s1201_s27 }
  0x3c   : > { %493 = vrot.lane.b32.xlu2 %v485_v31, %s1200_s26 }
  0x3e   : > { %v649_v34 = vld.sshfl [vmem:[#allocation1 + $0x10] sm:$0xff pattern:$0x75316420] }
  0x3f   : > { %730 = vst [vmem:[#allocation1 + $0x10] ss:$2 sm:$0xff] %v725_v33  ;;  %v655_v42 = vpack.c.bf16 %v649_v34, %v649_v34 }
  0x40   : > { %v648_v35 = vld.sshfl [vmem:[#allocation1 + $0x8] sm:$0xff pattern:$0x75316420]  ;;  %v647_v36 = vld.sshfl [vmem:[#allocation1] sm:$0xff pattern:$0x75316420] }
  0x41   : > { %v654_v38 = vpack.c.bf16 %v648_v35, %v648_v35  ;;  %v653_v39 = vpack.c.bf16 %v647_v36, %v647_v36  ;;  %728 = vst [vmem:[#allocation1] ss:$2 sm:$0xff] %v1255_v1  ;;  %v1144_v35 = vld [vmem:[%s1406_s1 + $0xc] sm:$0xf] }
  0x43   : > { %663 = vrot.lane.b32.xlu1 %v654_v38, %s1202_s28  ;;  %661 = vrot.lane.b32.xlu0 %v653_v39, %s1202_s28 }
  0x44   : > { %579 = vrot.lane.b32.xlu2 %v570_v37, %s1201_s27 }
  0x46   : > { %v733_v40 = vld.sshfl [vmem:[#allocation1 + $0x10] sm:$0xff pattern:$0x75316420]  ;;  %v734_v41 = vld.sshfl [vmem:[#allocation1 + $0x18] sm:$0xff pattern:$0x75316420] }
  0x47   : > { %821 = vst [vmem:[#allocation1 + $0x10] ss:$2 sm:$0xff] %v725_v33  ;;  %v741_v52 = vpack.c.bf16 %v733_v40, %v733_v40  ;;  %v742_v56 = vpack.c.bf16 %v734_v41, %v734_v41 }
  0x48   : > { %v731_v43 = vld.sshfl [vmem:[#allocation1] sm:$0xff pattern:$0x75316420]  ;;  %v732_v44 = vld.sshfl [vmem:[#allocation1 + $0x8] sm:$0xff pattern:$0x75316420] }
  0x49   : > { %v740_v45 = vpack.c.bf16 %v732_v44, %v732_v44  ;;  %819 = vst [vmem:[#allocation1] ss:$2 sm:$0xff] %v1255_v1  ;;  %v739_v46 = vpack.c.bf16 %v731_v43, %v731_v43 }
  0x4b   : > { %665 = vrot.lane.b32.xlu1 %v655_v42, %s1202_s28  ;;  %751 = vrot.lane.b32.xlu0 %v740_v45, %s1203_s29 }
  0x4c   : > { %749 = vrot.lane.b32.xlu2 %v739_v46, %s1203_s29 }
  0x4e   : > { %v824_v47 = vld.sshfl [vmem:[#allocation1 + $0x10] sm:$0xff pattern:$0x75316420]  ;;  %v825_v48 = vld.sshfl [vmem:[#allocation1 + $0x18] sm:$0xff pattern:$0x75316420] }
  0x4f   : > { %v832_v49 = vpack.c.bf16 %v824_v47, %v824_v47  ;;  %912 = vst [vmem:[#allocation1 + $0x10] ss:$2 sm:$0xff] %v725_v33  ;;  %v833_v55 = vpack.c.bf16 %v825_v48, %v825_v48 }
  0x50   : > { %v823_v50 = vld.sshfl [vmem:[#allocation1 + $0x8] sm:$0xff pattern:$0x75316420]  ;;  %v822_v51 = vld.sshfl [vmem:[#allocation1] sm:$0xff pattern:$0x75316420] }
  0x51   : > { %v831_v53 = vpack.c.bf16 %v823_v50, %v823_v50  ;;  %910 = vst [vmem:[#allocation1] ss:$2 sm:$0xff] %v1255_v1  ;;  %v830_v54 = vpack.c.bf16 %v822_v51, %v822_v51  ;;  %v250_v1 = vpack.c.bf16 %v1261_v4, %v1261_v4 }
  0x53   : > { %842 = vrot.lane.b32.xlu0 %v831_v53, %s1204_s30  ;;  %844 = vrot.lane.b32.xlu1 %v832_v49, %s1204_s30  ;;  %v341_v2 = vsel %vm288_vm0, %v250_v1, 0  ;;  %v1152_v49 = vld [vmem:[%s1406_s1 + $0x14] sm:$0xf] }
  0x54   : > { %753 = vrot.lane.b32.xlu2 %v741_v52, %s1203_s29  ;;  %356 = vmatpush.bf16.msra.mxu3 %v341_v2  ;;  %v1156_v2 = vld [vmem:[%s1406_s1 + $0x18] sm:$0xf] }
  0x56   : > { %v916_v57 = vld.sshfl [vmem:[#allocation1 + $0x18] sm:$0xff pattern:$0x75316420]  ;;  %v915_v59 = vld.sshfl [vmem:[#allocation1 + $0x10] sm:$0xff pattern:$0x75316420] }
  0x57   : > { %v924_v60 = vpack.c.bf16 %v916_v57, %v916_v57  ;;  %v923_v62 = vpack.c.bf16 %v915_v59, %v915_v59  ;;  %1137 = vmatmul.msk.bf16.vlgmr.msra.gmra.mxu3 %vm284_vm1, %v1284_v6 }
  0x58   : > { %v913_v58 = vld.sshfl [vmem:[#allocation1] sm:$0xff pattern:$0x75316420]  ;;  %v914_v63 = vld.sshfl [vmem:[#allocation1 + $0x8] sm:$0xff pattern:$0x75316420] }
  0x59   : > { %v921_v61 = vpack.c.bf16 %v913_v58, %v913_v58  ;;  %v922_v0 = vpack.c.bf16 %v914_v63, %v914_v63 }
  0x5b   : > { %840 = vrot.lane.b32.xlu0 %v830_v54, %s1204_s30  ;;  %846 = vrot.lane.b32.xlu1 %v833_v55, %s1204_s30 }
  0x5c   : > { %755 = vrot.lane.b32.xlu2 %v742_v56, %s1203_s29  ;;  %s1171_s29 = smul.u32 24, %s1412_s19 }
  0x5e   : > { %s231_s7 = scalar_lea.vmem %s1409_s4, %s1171_s29 }
  0x63   : > { %937 = vrot.lane.b32.xlu0 %v924_v60, %s1205_s6  ;;  %931 = vrot.lane.b32.xlu1 %v921_v61, %s1205_s6  ;;  %v1148_v60 = vld [vmem:[%s1406_s1 + $0x10] sm:$0xf] }
  0x64   : > { %935 = vrot.lane.b32.xlu2 %v923_v62, %s1205_s6 }
  0x6c   : > { %933 = vrot.lane.b32.xlu2 %v922_v0, %s1205_s6 }
  0x85   : > { %v412_v7 = vpop.permute.xlu2 %411 }
  0x8e   : > { %v414_v8 = vpop.permute.xlu2 %413 }
  0x8f   : > { %v417_v9 = vsel %vm415_vm2, %v412_v7, %v414_v8  ;;  %v428_v26 = vsel %vm288_vm0, %v414_v8, 0 }
  0x90   : > { %v425_v4 = vsel %vm288_vm0, %v417_v9, 0 }
  0x91   : > { %450 = vmatpush.bf16.msrb.mxu3 %v425_v4 }
  0x93   : > { %v280_v11 = vpop.permute.xlu0 %279 }
  0x94   : > { %v296_v13 = vsel %vm288_vm0, %v280_v11, 0  ;;  %1142 = vmatmul.msk.bf16.vlgmr.msrb.gmra.mxu3 %vm284_vm1, %v1295_v12 }
  0x95   : > { %v278_v14 = vpop.permute.xlu1 %277  ;;  %331 = vmatpush.bf16.msra.mxu2 %v296_v13 }
  0x96   : > { %v283_v3 = vsel %vm281_vm3, %v278_v14, %v280_v11  ;;  %v494_v22 = vpop.permute.xlu2 %493 }
  0x97   : > { %v293_v17 = vsel %vm288_vm0, %v283_v3, 0 }
  0x98   : > { %318 = vmatpush.bf16.msra.mxu1 %v293_v17  ;;  %1136 = vmatmul.msk.bf16.vlgmr.msra.gmra.mxu2 %vm284_vm1, %v1133_v15 }
  0x9b   : > { %1135 = vmatmul.msk.bf16.vlgmr.msra.gmra.mxu1 %vm284_vm1, %v1133_v15  ;;  %v276_v19 = vpop.permute.xlu0 %275 }
  0x9c   : > { %382 = vmatpush.bf16.msrb.mxu1 %v347_v16  ;;  %v282_v20 = vsel %vm281_vm3, %v276_v19, %v278_v14  ;;  %v1160_v19 = vld [vmem:[%s1406_s1 + $0x1c] sm:$0xf] }
  0x9d   : > { %v410_v23 = vpop.permute.xlu1 %409  ;;  %v290_v24 = vsel %vm288_vm0, %v282_v20, 0 }
  0x9e   : > { %305 = vmatpush.bf16.msra.mxu0 %v290_v24  ;;  %v416_v25 = vsel %vm415_vm2, %v410_v23, %v412_v7  ;;  %v580_v5 = vpop.permute.xlu2 %579  ;;  %v1206_v23 = vmov 0   ;;  %v1164_v24 = vld [vmem:[%s1406_s1 + $0x20] sm:$0xf] }
  0x9f   : > { %v422_v27 = vsel %vm288_vm0, %v416_v25, 0  ;;  %1189 = vset.pattern.permute.xlu0 %v1206_v23 }
  0xa0   : > { %437 = vmatpush.bf16.msrb.mxu2 %v422_v27 }
  0xa1   : > { %1134 = vmatmul.msk.bf16.vlgmr.msra.gmra.mxu0 %vm284_vm1, %v1133_v15 }
  0xa2   : > { %369 = vmatpush.bf16.msrb.mxu0 %v344_v21 }
  0xa5   : > { %v498_v28 = vpop.permute.xlu1 %497  ;;  %v496_v29 = vpop.permute.xlu0 %495 }
  0xa6   : > { %463 = vmatpush.bf16.msra.mxu0 %v428_v26  ;;  %v512_v30 = vsel %vm288_vm0, %v498_v28, 0  ;;  %v500_v31 = vsel %vm499_vm4, %v494_v22, %v496_v29  ;;  %v501_v32 = vsel %vm499_vm4, %v496_v29, %v498_v28  ;;  %v750_v36 = vpop.permute.xlu2 %749  ;;  %v997_v22 = vld [vmem:[%s1407_s2] sm:$0xff] }
  0xa7   : > { %v506_v33 = vsel %vm288_vm0, %v500_v31, 0  ;;  %v509_v34 = vsel %vm288_vm0, %v501_v32, 0  ;;  %547 = vmatpush.bf16.msra.mxu3 %v512_v30  ;;  %1000 = vperm.xlu0 %1189, %v997_v22  }
  0xa8   : > { %1141 = vmatmul.msk.bf16.vlgmr.msrb.gmra.mxu2 %vm284_vm1, %v1295_v12  ;;  %521 = vmatpush.bf16.msra.mxu1 %v506_v33 }
  0xa9   : > { %534 = vmatpush.bf16.msra.mxu2 %v509_v34 }
  0xaa   : > { %1147 = vmatmul.msk.bf16.vlgmr.msra.gmra.mxu3 %vm284_vm1, %v1144_v35 }
  0xab   : > { %1139 = vmatmul.msk.bf16.vlgmr.msrb.gmra.mxu1 %vm284_vm1, %v1284_v6 }
  0xad   : > { %v578_v37 = vpop.permute.xlu1 %577  ;;  %v582_v38 = vpop.permute.xlu0 %581 }
  0xae   : > { %v596_v39 = vsel %vm288_vm0, %v582_v38, 0  ;;  %v584_v40 = vsel %vm583_vm5, %v578_v37, %v580_v5  ;;  %v585_v41 = vsel %vm583_vm5, %v580_v5, %v582_v38  ;;  %v754_v48 = vpop.permute.xlu2 %753 }
  0xaf   : > { %v590_v42 = vsel %vm288_vm0, %v584_v40, 0  ;;  %v593_v43 = vsel %vm288_vm0, %v585_v41, 0  ;;  %631 = vmatpush.bf16.msrb.mxu2 %v596_v39 }
  0xb0   : > { %618 = vmatpush.bf16.msrb.mxu1 %v593_v43 }
  0xb1   : > { %1138 = vmatmul.msk.bf16.vlgmr.msrb.gmra.mxu0 %vm284_vm1, %v1284_v6 }
  0xb2   : > { %605 = vmatpush.bf16.msrb.mxu0 %v590_v42 }
  0xb5   : > { %v664_v44 = vpop.permute.xlu1 %663  ;;  %v662_v45 = vpop.permute.xlu0 %661 }
  0xb6   : > { %v668_v46 = vsel %vm667_vm6, %v662_v45, %v664_v44  ;;  %v756_v59 = vpop.permute.xlu2 %755 }
  0xb7   : > { %v674_v47 = vsel %vm288_vm0, %v668_v46, 0  ;;  %v760_v6 = vsel %vm757_vm7, %v754_v48, %v756_v59 }
  0xb8   : > { %1146 = vmatmul.msk.bf16.vlgmr.msra.gmra.mxu2 %vm284_vm1, %v1144_v35  ;;  %689 = vmatpush.bf16.msrb.mxu3 %v674_v47  ;;  %v771_v10 = vsel %vm288_vm0, %v760_v6, 0 }
  0xbb   : > { %1145 = vmatmul.msk.bf16.vlgmr.msra.gmra.mxu1 %vm284_vm1, %v1144_v35  ;;  %1153 = vmatmul.msk.bf16.vlgmr.msrb.gmra.mxu3 %vm284_vm1, %v1152_v49 }
  0xbd   : > { %v666_v50 = vpop.permute.xlu1 %665  ;;  %v752_v51 = vpop.permute.xlu0 %751 }
  0xbe   : > { %v669_v52 = vsel %vm667_vm6, %v664_v44, %v666_v50  ;;  %v680_v53 = vsel %vm288_vm0, %v666_v50, 0  ;;  %v758_v54 = vsel %vm757_vm7, %v750_v36, %v752_v51  ;;  %v759_v55 = vsel %vm757_vm7, %v752_v51, %v754_v48  ;;  %v936_v1 = vpop.permute.xlu2 %935 }
  0xbf   : > { %v677_v56 = vsel %vm288_vm0, %v669_v52, 0  ;;  %v765_v57 = vsel %vm288_vm0, %v758_v54, 0  ;;  %v768_v58 = vsel %vm288_vm0, %v759_v55, 0  ;;  %715 = vmatpush.bf16.msra.mxu1 %v680_v53 }
  0xc0   : > { %780 = vmatpush.bf16.msra.mxu2 %v765_v57  ;;  %793 = vmatpush.bf16.msra.mxu3 %v768_v58 }
  0xc1   : > { %1143 = vmatmul.msk.bf16.vlgmr.msra.gmra.mxu0 %vm284_vm1, %v1295_v12 }
  0xc2   : > { %702 = vmatpush.bf16.msra.mxu0 %v677_v56 }
  0xc5   : > { %v843_v61 = vpop.permute.xlu0 %842  ;;  %v845_v62 = vpop.permute.xlu1 %844 }
  0xc6   : > { %v850_v63 = vsel %vm848_vm8, %v843_v61, %v845_v62  ;;  %v934_v13 = vpop.permute.xlu2 %933 }
  0xc7   : > { %v859_v0 = vsel %vm288_vm0, %v850_v63, 0  ;;  %v941_v15 = vsel %vm939_vm9, %v934_v13, %v936_v1 }
  0xc8   : > { %1151 = vmatmul.msk.bf16.vlgmr.msrb.gmra.mxu2 %vm284_vm1, %v1148_v60  ;;  %v950_v17 = vsel %vm288_vm0, %v941_v15, 0 }
  0xc9   : > { %884 = vmatpush.bf16.msrb.mxu2 %v859_v0 }
  0xcb   : > { %1150 = vmatmul.msk.bf16.vlgmr.msrb.gmra.mxu1 %vm284_vm1, %v1148_v60  ;;  %1158 = vmatmul.msk.bf16.vlgmr.msra.gmra.mxu3 %vm284_vm1, %v1156_v2 }
  0xcd   : > { %v841_v7 = vpop.permute.xlu0 %840  ;;  %v847_v8 = vpop.permute.xlu1 %846 }
  0xce   : > { %v849_v9 = vsel %vm848_vm8, %v841_v7, %v843_v61  ;;  %v851_v4 = vsel %vm848_vm8, %v845_v62, %v847_v8 }
  0xcf   : > { %v856_v11 = vsel %vm288_vm0, %v849_v9, 0  ;;  %v862_v12 = vsel %vm288_vm0, %v851_v4, 0 }
  0xd0   : > { %871 = vmatpush.bf16.msrb.mxu1 %v856_v11  ;;  %897 = vmatpush.bf16.msrb.mxu3 %v862_v12 }
  0xd1   : > { %1149 = vmatmul.msk.bf16.vlgmr.msrb.gmra.mxu0 %vm284_vm1, %v1148_v60 }
  0xd2   : > { %806 = vmatpush.bf16.msrb.mxu0 %v771_v10 }
  0xd5   : > { %v938_v14 = vpop.permute.xlu0 %937  ;;  %v932_v18 = vpop.permute.xlu1 %931 }
  0xd6   : > { %v942_v3 = vsel %vm939_vm9, %v936_v1, %v938_v14  ;;  %v940_v20 = vsel %vm939_vm9, %v932_v18, %v934_v13 }
  0xd7   : > { %v953_v16 = vsel %vm288_vm0, %v942_v3, 0  ;;  %v947_v21 = vsel %vm288_vm0, %v940_v20, 0 }
  0xd8   : > { %1157 = vmatmul.msk.bf16.vlgmr.msra.gmra.mxu2 %vm284_vm1, %v1156_v2 }
  0xd9   : > { %988 = vmatpush.bf16.msra.mxu2 %v953_v16 }
  0xda   : > { %v358_v25 = vpop.f32.mrf.mxu3 }
  0xdb   : > { %1155 = vmatmul.msk.bf16.vlgmr.msra.gmra.mxu1 %vm284_vm1, %v1152_v49  ;;  %1163 = vmatmul.msk.bf16.vlgmr.msrb.gmra.mxu3 %vm284_vm1, %v1160_v19 }
  0xdc   : > { %975 = vmatpush.bf16.msra.mxu1 %v950_v17 }
  0xe1   : > { %1154 = vmatmul.msk.bf16.vlgmr.msra.gmra.mxu0 %vm284_vm1, %v1152_v49 }
  0xe2   : > { %962 = vmatpush.bf16.msra.mxu0 %v947_v21  ;;  %v360_v26 = vpop.f32.mrf.mxu3 }
  0xe8   : > { %1162 = vmatmul.msk.bf16.vlgmr.msrb.gmra.mxu2 %vm284_vm1, %v1160_v19 }
  0xeb   : > { %1161 = vmatmul.msk.bf16.vlgmr.msrb.gmra.mxu1 %vm284_vm1, %v1160_v19 }
  0xf1   : > { %1159 = vmatmul.msk.bf16.vlgmr.msrb.gmra.mxu0 %vm284_vm1, %v1156_v2 }
  0xf8   : > { %1167 = vmatmul.msk.bf16.vlgmr.msra.gmra.mxu2 %vm284_vm1, %v1164_v24 }
  0xfb   : > { %1166 = vmatmul.msk.bf16.vlgmr.msra.gmra.mxu1 %vm284_vm1, %v1164_v24 }
 0x101   : > { %1165 = vmatmul.msk.bf16.vlgmr.msra.gmra.mxu0 %vm284_vm1, %v1164_v24 }
 0x117   : > { %v452_v27 = vpop.f32.mrf.mxu3 }
 0x118   : > { %v320_v5 = vpop.f32.mrf.mxu1 }
 0x11b   : > { %v333_v28 = vpop.f32.mrf.mxu2 }
 0x11e   : > { %v307_v29 = vpop.f32.mrf.mxu0 }
 0x11f   : > { %v359_v30 = vadd.f32 %v358_v25, %v307_v29  ;;  %v454_v31 = vpop.f32.mrf.mxu3 }
 0x120   : > { %v322_v32 = vpop.f32.mrf.mxu1 }
 0x123   : > { %v335_v33 = vpop.f32.mrf.mxu2 }
 0x126   : > { %v309_v34 = vpop.f32.mrf.mxu0 }
 0x128   : > { %v384_v35 = vpop.f32.mrf.mxu1 }
 0x129   : > { %v385_v36 = vadd.f32 %v384_v35, %v333_v28 }
 0x12b   : > { %v439_v37 = vpop.f32.mrf.mxu2 }
 0x12c   : > { %v469_v38 = vadd.f32 %v439_v37, %v359_v30  ;;  %v1010_v30 = vld [vmem:[%s1408_s3] sm:$0x7] }
 0x12d   : > { %v549_v39 = vpop.f32.mrf.mxu3  ;;  %v1014_v35 = vperm.slane %v1010_v30, 2  ;;  %v1013_v37 = vperm.slane %v1010_v30, 1 }
 0x12e   : > { %v371_v40 = vpop.f32.mrf.mxu0 }
 0x12f   : > { %v372_v41 = vadd.f32 %v371_v40, %v320_v5 }
 0x130   : > { %v386_v42 = vpop.f32.mrf.mxu1 }
 0x131   : > { %v470_v43 = vadd.f32 %v452_v27, %v372_v41  ;;  %v1001_v27 = vpop.permute.xlu0 %1000  ;;  %v1012_v41 = vperm.slane %v1010_v30, 0 }
 0x133   : > { %v441_v44 = vpop.f32.mrf.mxu2 }
 0x135   : > { %v551_v45 = vpop.f32.mrf.mxu3 }
 0x136   : > { %v373_v46 = vpop.f32.mrf.mxu0 }
 0x138   : > { %v523_v47 = vpop.f32.mrf.mxu1 }
 0x139   : > { %v553_v18 = vadd.f32 %v523_v47, %v469_v38 }
 0x13b   : > { %v536_v48 = vpop.f32.mrf.mxu2 }
 0x13c   : > { %v554_v13 = vadd.f32 %v536_v48, %v470_v43 }
 0x13e   : > { %v465_v49 = vpop.f32.mrf.mxu0  ;;  %v691_v50 = vpop.f32.mrf.mxu3 }
 0x13f   : > { %v471_v51 = vadd.f32 %v465_v49, %v385_v36 }
 0x140   : > { %v525_v52 = vpop.f32.mrf.mxu1 }
 0x141   : > { %v555_v53 = vadd.f32 %v549_v39, %v471_v51 }
 0x143   : > { %v538_v54 = vpop.f32.mrf.mxu2 }
 0x146   : > { %v467_v55 = vpop.f32.mrf.mxu0  ;;  %v693_v56 = vpop.f32.mrf.mxu3 }
 0x148   : > { %v620_v57 = vpop.f32.mrf.mxu1 }
 0x149   : > { %v638_v15 = vadd.f32 %v620_v57, %v554_v13 }
 0x14b   : > { %v633_v58 = vpop.f32.mrf.mxu2 }
 0x14c   : > { %v639_v17 = vadd.f32 %v633_v58, %v555_v53 }
 0x14e   : > { %v607_v59 = vpop.f32.mrf.mxu0  ;;  %v795_v60 = vpop.f32.mrf.mxu3 }
 0x14f   : > { %v637_v21 = vadd.f32 %v607_v59, %v553_v18 }
 0x150   : > { %v622_v61 = vpop.f32.mrf.mxu1 }
 0x151   : > { %v721_v5 = vadd.f32 %v691_v50, %v637_v21 }
 0x153   : > { %v635_v62 = vpop.f32.mrf.mxu2 }
 0x156   : > { %v609_v63 = vpop.f32.mrf.mxu0  ;;  %v797_v0 = vpop.f32.mrf.mxu3 }
 0x158   : > { %v717_v1 = vpop.f32.mrf.mxu1 }
 0x159   : > { %v723_v20 = vadd.f32 %v717_v1, %v639_v17 }
 0x15b   : > { %v782_v2 = vpop.f32.mrf.mxu2 }
 0x15c   : > { %v812_v31 = vadd.f32 %v782_v2, %v721_v5 }
 0x15e   : > { %v704_v6 = vpop.f32.mrf.mxu0  ;;  %v899_v7 = vpop.f32.mrf.mxu3 }
 0x15f   : > { %v722_v16 = vadd.f32 %v704_v6, %v638_v15 }
 0x160   : > { %v719_v8 = vpop.f32.mrf.mxu1 }
 0x161   : > { %v813_v22 = vadd.f32 %v795_v60, %v722_v16 }
 0x163   : > { %v784_v9 = vpop.f32.mrf.mxu2 }
 0x166   : > { %v706_v4 = vpop.f32.mrf.mxu0  ;;  %v901_v10 = vpop.f32.mrf.mxu3 }
 0x168   : > { %v873_v11 = vpop.f32.mrf.mxu1 }
 0x169   : > { %v903_v36 = vadd.f32 %v873_v11, %v812_v31 }
 0x16b   : > { %v886_v12 = vpop.f32.mrf.mxu2 }
 0x16c   : > { %v904_v25 = vadd.f32 %v886_v12, %v813_v22 }
 0x16e   : > { %v808_v14 = vpop.f32.mrf.mxu0 }
 0x16f   : > { %v814_v23 = vadd.f32 %v808_v14, %v723_v20 }
 0x170   : > { %v875_v3 = vpop.f32.mrf.mxu1 }
 0x171   : > { %v905_v29 = vadd.f32 %v899_v7, %v814_v23 }
 0x173   : > { %v888_v19 = vpop.f32.mrf.mxu2 }
 0x176   : > { %v810_v24 = vpop.f32.mrf.mxu0 }
 0x178   : > { %v977_v26 = vpop.f32.mrf.mxu1 }
 0x179   : > { %v995_v28 = vadd.f32 %v977_v26, %v904_v25 }
 0x17b   : > { %v1004_v32 = vadd.f32 %v1001_v27, %v995_v28  ;;  %v990_v33 = vpop.f32.mrf.mxu2 }
 0x17c   : > { %v996_v34 = vadd.f32 %v990_v33, %v905_v29 }
 0x17d   : > { %1007 = vst [vmem:[%s231_s7 + $0x8] sm:$0xff] %v1004_v32  ;;  %v1019_v44 = vmul.f32 %v1013_v37, %v1004_v32 }
 0x17e   : > { %v1005_v38 = vadd.f32 %v1001_v27, %v996_v34  ;;  %v964_v39 = vpop.f32.mrf.mxu0 }
 0x17f   : > { %v994_v40 = vadd.f32 %v964_v39, %v903_v36  ;;  %v1027_v51 = vmul.f32 %v1019_v44, %v1019_v44 }
 0x180   : > { %v979_v42 = vpop.f32.mrf.mxu1  ;;  %1009 = vst.msk [vmem:[%s231_s7 + $0x10] sm:$0xff] %vm1008_vm10, %v1005_v38  ;;  %v1020_v43 = vmul.f32 %v1014_v35, %v1005_v38 }
 0x181   : > { %v1003_v45 = vadd.f32 %v1001_v27, %v994_v40 }
 0x182   : > { %v1028_v48 = vmul.f32 %v1020_v43, %v1020_v43  ;;  %v1022_v53 = vsel %vm1008_vm10, %v1020_v43, 0.0 }
 0x183   : > { %1006 = vst [vmem:[%s231_s7] sm:$0xff] %v1003_v45  ;;  %v1018_v46 = vmul.f32 %v1012_v41, %v1003_v45  ;;  %v992_v47 = vpop.f32.mrf.mxu2 }
 0x184   : > { %v1030_v56 = vsel %vm1008_vm10, %v1028_v48, 0.0 }
 0x185   : > { %v1021_v49 = vadd.f32 %v1019_v44, %v1018_v46  ;;  %v1026_v50 = vmul.f32 %v1018_v46, %v1018_v46 }
 0x186   : > { %v966_v52 = vpop.f32.mrf.mxu0 }
 0x187   : > { %v1023_v54 = vadd.f32 %v1022_v53, %v1021_v49  ;;  %v1029_v55 = vadd.f32 %v1027_v51, %v1026_v50 }
 0x189   : > { %1024 = vadd.xlane.f32.xlu1 %v1023_v54  ;;  %v1031_v57 = vadd.f32 %v1030_v56, %v1029_v55 }
 0x18b   : > { %1032 = vadd.xlane.f32.xlu2 %v1031_v57 }
 0x1fc   : > { %v1025_v58 = vpop.xlane.xlu1 %1024 }
 0x1fe   : > { %v1033_v59 = vpop.xlane.xlu2 %1032 }
 0x1ff   : > { %v1035_v60 = vsel %vm1034_vm11, %v1025_v58, %v1033_v59 }
 0x200   : > { %1037 = vst.msk [vmem:[%s235_s13] sm:$0xff] %vm1036_vm12, %v1035_v60 }
 0x201 PF: > { %s16_s18 = sadd.s32 1, %s1196_s18  }
 0x202   : > { %p13_p4 = scmp.ge.s32.totalorder %s16_s18, 4  }
 0x204   :  { %15 = sbr.rel (!%p13_p4) target bundleno = 1 (0x1), region = 95 }

// kernel: encoder_block_forward.3
= control target key start
LH: loop header
LB: loop body
LE: loop exit
PB: predicated region body
PF: predicated region fallthrough
CT: control target
= control target key end

     0   :  { %s2383_s24 = smov 0   ;;  %s3175_s0 = inlined_call_operand.vmem [shape: f32[2,8,360], index: 0, kind: input, shape index: {}]   ;;  %s3176_s1 = inlined_call_operand.vmem [shape: f32[8,2], index: 1, kind: input, shape index: {}]   ;;  %s3177_s2 = inlined_call_operand.vmem [shape: bf16[4,8,8], index: 2, kind: input, shape index: {}]   ;;  %s3178_s3 = inlined_call_operand.vmem [shape: f32[8,1], index: 3, kind: input, shape index: {}]   ;;  %s3179_s4 = inlined_call_operand.vmem [shape: f32[360,324], index: 4, kind: input, shape index: {}]   ;;  %s3180_s5 = inlined_call_operand.vmem [shape: bf16[4,360,81], index: 5, kind: input, shape index: {}]   ;;  %s3181_s6 = inlined_call_operand.vmem [shape: f32[2,8,324], index: 6, kind: output, shape index: {0}]   ;;  %s3182_s7 = inlined_call_operand.vmem [shape: f32[2,8,81], index: 7, kind: output, shape index: {1}]  }
   0x1 LB: > { %s1719_s25 = sadd.s32 4294967295, %s2339_s24   ;;  %p1723_p0 = scmp.ge.s32.totalorder %s2339_s24, 1  ;;  %s2339_s24 = sphi %s2383_s24, %s18_s24  }
   0x2   : > { %p240_p1 = scmp.lt.s32.totalorder %s2339_s24, 3 }
   0x4   : > { %p241_p2 = pnand %p1723_p0, %p240_p1 }
   0x5   : > { %p276_p3 = scmp.lt.s32.totalorder (!%p241_p2), %s1719_s25, 1 }
   0x6   : > { %244 = sbr.rel (%p241_p2) target bundleno = 683 (0x2ab), region = 44 }
   0xb   : > { %v294_v0 = vld [vmem:[%s3176_s1] sm:$0xff]  ;;  %v406_v1 = vld [vmem:[%s3179_s4 + $0x2e8] sm:$0xff]  ;;  %v359_v2 = vld [vmem:[%s3179_s4 + $0x170] sm:$0xff]  ;;  %v2341_v3 = vmov 0   ;;  %v2342_v22 = vmov 1   ;;  %s3184_s25 = smov (!%p276_p3, %s1719_s25), 1 }
   0xc   : > { %2329 = vset.pattern.permute.xlu0 %v2341_v3  ;;  %472 = vmatpush.msra.mxu1 %v406_v1  ;;  %v403_v4 = vld [vmem:[%s3179_s4 + $0x2d0] sm:$0xff]  ;;  %v356_v5 = vld [vmem:[%s3179_s4 + $0x158] sm:$0xff]  ;;  %v358_v7 = vld [vmem:[%s3179_s4 + $0x168] sm:$0xff]  ;;  %s2318_s18 = smul.u32 24, %s3184_s25  ;;  %vm822_vm0 = vcmask 1043456   ;;  %vm448_vm1 = vcmask 850944  }
   0xd   : > { %297 = vperm.xlu0 %2329, %v294_v0   ;;  %512 = vmatpush.msra.mxu3 %v359_v2  ;;  %v400_v6 = vld [vmem:[%s3179_s4 + $0x2b8] sm:$0xff]  ;;  %v353_v8 = vld [vmem:[%s3179_s4 + $0x140] sm:$0xff]  ;;  %v355_v10 = vld [vmem:[%s3179_s4 + $0x150] sm:$0xff]  ;;  %vm634_vm2 = vcmask 556032   ;;  %vm1093_vm3 = vcmask 64512   ;;  %s1726_s23 = sshll.u32 %s3184_s25, 3 }
   0xe   : > { %473 = vmatpush.msra.mxu1 %v403_v4  ;;  %452 = vmatpush.msra.mxu0 %v358_v7  ;;  %v445_v9 = vld [vmem:[%s3179_s4 + $0x420] sm:$0xff]  ;;  %v442_v12 = vld [vmem:[%s3179_s4 + $0x408] sm:$0xff]  ;;  %v352_v14 = vld [vmem:[%s3179_s4 + $0x138] sm:$0xff]  ;;  %s280_s21 = scalar_lea.vmem %s3175_s0, %s2318_s18  ;;  %s285_s17 = scalar_lea.vmem %s3181_s6, %s2318_s18  ;;  %vm1631_vm4 = vcmask 662528  }
   0xf   : > { %513 = vmatpush.msra.mxu3 %v356_v5  ;;  %v397_v11 = vld [vmem:[%s3179_s4 + $0x2a0] sm:$0xff]  ;;  %495 = vmatpush.msra.mxu2 %v445_v9  ;;  %v350_v13 = vld [vmem:[%s3179_s4 + $0x128] sm:$0xff]  ;;  %v439_v15 = vld [vmem:[%s3179_s4 + $0x3f0] sm:$0xff]  ;;  %s289_s28 = scalar_lea.vmem %s3182_s7, %s1726_s23 }
  0x10   : > { %474 = vmatpush.msra.mxu1 %v400_v6  ;;  %453 = vmatpush.msra.mxu0 %v355_v10  ;;  %v394_v16 = vld [vmem:[%s3179_s4 + $0x288] sm:$0xff]  ;;  %v349_v17 = vld [vmem:[%s3179_s4 + $0x120] sm:$0xff]  ;;  %v347_v18 = vld [vmem:[%s3179_s4 + $0x110] sm:$0xff] }
  0x11   : > { %514 = vmatpush.msra.mxu3 %v353_v8  ;;  %496 = vmatpush.msra.mxu2 %v442_v12  ;;  %v391_v19 = vld [vmem:[%s3179_s4 + $0x270] sm:$0xff]  ;;  %v344_v20 = vld [vmem:[%s3179_s4 + $0xf8] sm:$0xff]  ;;  %v346_v24 = vld [vmem:[%s3179_s4 + $0x108] sm:$0xff] }
  0x12   : > { %475 = vmatpush.msra.mxu1 %v397_v11  ;;  %454 = vmatpush.msra.mxu0 %v352_v14  ;;  %v436_v21 = vld [vmem:[%s3179_s4 + $0x3d8] sm:$0xff]  ;;  %v341_v25 = vld [vmem:[%s3179_s4 + $0xe0] sm:$0xff]  ;;  %v343_v28 = vld [vmem:[%s3179_s4 + $0xf0] sm:$0xff] }
  0x13   : > { %515 = vmatpush.msra.mxu3 %v350_v13  ;;  %497 = vmatpush.msra.mxu2 %v439_v15  ;;  %v388_v23 = vld [vmem:[%s3179_s4 + $0x258] sm:$0xff]  ;;  %v433_v26 = vld [vmem:[%s3179_s4 + $0x3c0] sm:$0xff]  ;;  %v338_v29 = vld [vmem:[%s3179_s4 + $0xc8] sm:$0xff] }
  0x14   : > { %476 = vmatpush.msra.mxu1 %v394_v16  ;;  %455 = vmatpush.msra.mxu0 %v349_v17  ;;  %v385_v27 = vld [vmem:[%s3179_s4 + $0x240] sm:$0xff]  ;;  %v430_v30 = vld [vmem:[%s3179_s4 + $0x3a8] sm:$0xff]  ;;  %v340_v32 = vld [vmem:[%s3179_s4 + $0xd8] sm:$0xff] }
  0x15   : > { %2330 = vset.pattern.permute.xlu0 %v2342_v22  ;;  %516 = vmatpush.msra.mxu3 %v347_v18  ;;  %v382_v31 = vld [vmem:[%s3179_s4 + $0x228] sm:$0xff]  ;;  %v335_v33 = vld [vmem:[%s3179_s4 + $0xb0] sm:$0xff]  ;;  %v337_v36 = vld [vmem:[%s3179_s4 + $0xc0] sm:$0xff] }
  0x16   : > { %304 = vperm.xlu0 %2330, %v294_v0   ;;  %477 = vmatpush.msra.mxu1 %v391_v19  ;;  %v427_v34 = vld [vmem:[%s3179_s4 + $0x390] sm:$0xff]  ;;  %v332_v37 = vld [vmem:[%s3179_s4 + $0x98] sm:$0xff]  ;;  %v334_v40 = vld [vmem:[%s3179_s4 + $0xa8] sm:$0xff] }
  0x17   : > { %517 = vmatpush.msra.mxu3 %v344_v20  ;;  %498 = vmatpush.msra.mxu2 %v436_v21  ;;  %v379_v35 = vld [vmem:[%s3179_s4 + $0x210] sm:$0xff]  ;;  %v424_v38 = vld [vmem:[%s3179_s4 + $0x378] sm:$0xff]  ;;  %v329_v41 = vld [vmem:[%s3179_s4 + $0x80] sm:$0xff] }
  0x18   : > { %478 = vmatpush.msra.mxu1 %v388_v23  ;;  %456 = vmatpush.msra.mxu0 %v346_v24  ;;  %v376_v39 = vld [vmem:[%s3179_s4 + $0x1f8] sm:$0xff]  ;;  %v421_v42 = vld [vmem:[%s3179_s4 + $0x360] sm:$0xff]  ;;  %v331_v44 = vld [vmem:[%s3179_s4 + $0x90] sm:$0xff] }
  0x19   : > { %518 = vmatpush.msra.mxu3 %v341_v25  ;;  %499 = vmatpush.msra.mxu2 %v433_v26  ;;  %v373_v43 = vld [vmem:[%s3179_s4 + $0x1e0] sm:$0xff]  ;;  %v326_v45 = vld [vmem:[%s3179_s4 + $0x68] sm:$0xff]  ;;  %v328_v48 = vld [vmem:[%s3179_s4 + $0x78] sm:$0xff] }
  0x1a   : > { %479 = vmatpush.msra.mxu1 %v385_v27  ;;  %457 = vmatpush.msra.mxu0 %v343_v28  ;;  %v418_v46 = vld [vmem:[%s3179_s4 + $0x348] sm:$0xff]  ;;  %v323_v49 = vld [vmem:[%s3179_s4 + $0x50] sm:$0xff]  ;;  %v325_v52 = vld [vmem:[%s3179_s4 + $0x60] sm:$0xff] }
  0x1b   : > { %519 = vmatpush.msra.mxu3 %v338_v29  ;;  %500 = vmatpush.msra.mxu2 %v430_v30  ;;  %v370_v47 = vld [vmem:[%s3179_s4 + $0x1c8] sm:$0xff]  ;;  %v415_v50 = vld [vmem:[%s3179_s4 + $0x330] sm:$0xff]  ;;  %v320_v53 = vld [vmem:[%s3179_s4 + $0x38] sm:$0xff] }
  0x1c   : > { %480 = vmatpush.msra.mxu1 %v382_v31  ;;  %458 = vmatpush.msra.mxu0 %v340_v32  ;;  %v367_v51 = vld [vmem:[%s3179_s4 + $0x1b0] sm:$0xff]  ;;  %v412_v54 = vld [vmem:[%s3179_s4 + $0x318] sm:$0xff]  ;;  %v322_v56 = vld [vmem:[%s3179_s4 + $0x48] sm:$0xff] }
  0x1d   : > { %520 = vmatpush.msra.mxu3 %v335_v33  ;;  %501 = vmatpush.msra.mxu2 %v427_v34  ;;  %v364_v55 = vld [vmem:[%s3179_s4 + $0x198] sm:$0xff]  ;;  %v317_v57 = vld [vmem:[%s3179_s4 + $0x20] sm:$0xff]  ;;  %v407_v60 = vld [vmem:[%s3179_s4 + $0x2f0] sm:$0xff] }
  0x1e   : > { %481 = vmatpush.msra.mxu1 %v379_v35  ;;  %459 = vmatpush.msra.mxu0 %v337_v36  ;;  %v409_v58 = vld [vmem:[%s3179_s4 + $0x300] sm:$0xff]  ;;  %v314_v61 = vld [vmem:[%s3179_s4 + $0x8] sm:$0xff]  ;;  %v360_v62 = vld [vmem:[%s3179_s4 + $0x178] sm:$0xff] }
  0x1f   : > { %521 = vmatpush.msra.mxu3 %v332_v37  ;;  %502 = vmatpush.msra.mxu2 %v424_v38  ;;  %v361_v59 = vld [vmem:[%s3179_s4 + $0x180] sm:$0xff]  ;;  %v408_v63 = vld [vmem:[%s3179_s4 + $0x2f8] sm:$0xff]  ;;  %v319_v0 = vld [vmem:[%s3179_s4 + $0x30] sm:$0xff] }
  0x20   : > { %482 = vmatpush.msra.mxu1 %v376_v39  ;;  %460 = vmatpush.msra.mxu0 %v334_v40  ;;  %v404_v1 = vld [vmem:[%s3179_s4 + $0x2d8] sm:$0xff]  ;;  %v357_v2 = vld [vmem:[%s3179_s4 + $0x160] sm:$0xff]  ;;  %v354_v7 = vld [vmem:[%s3179_s4 + $0x148] sm:$0xff] }
  0x21   : > { %522 = vmatpush.msra.mxu3 %v329_v41  ;;  %503 = vmatpush.msra.mxu2 %v421_v42  ;;  %v405_v4 = vld [vmem:[%s3179_s4 + $0x2e0] sm:$0xff]  ;;  %v316_v5 = vld [vmem:[%s3179_s4 + $0x18] sm:$0xff]  ;;  %v402_v8 = vld [vmem:[%s3179_s4 + $0x2c8] sm:$0xff] }
  0x22   : > { %483 = vmatpush.msra.mxu1 %v373_v43  ;;  %461 = vmatpush.msra.mxu0 %v331_v44  ;;  %v401_v6 = vld [vmem:[%s3179_s4 + $0x2c0] sm:$0xff]  ;;  %v398_v10 = vld [vmem:[%s3179_s4 + $0x2a8] sm:$0xff]  ;;  %v351_v12 = vld [vmem:[%s3179_s4 + $0x130] sm:$0xff] }
  0x23   : > { %523 = vmatpush.msra.mxu3 %v326_v45  ;;  %504 = vmatpush.msra.mxu2 %v418_v46  ;;  %v313_v9 = vld [vmem:[%s3179_s4] sm:$0xff]  ;;  %v446_v11 = vld [vmem:[%s3179_s4 + $0x428] sm:$0xff]  ;;  %v399_v13 = vld [vmem:[%s3179_s4 + $0x2b0] sm:$0xff] }
  0x24   : > { %484 = vmatpush.msra.mxu1 %v370_v47  ;;  %462 = vmatpush.msra.mxu0 %v328_v48  ;;  %v395_v14 = vld [vmem:[%s3179_s4 + $0x290] sm:$0xff]  ;;  %v348_v16 = vld [vmem:[%s3179_s4 + $0x118] sm:$0xff]  ;;  %v345_v20 = vld [vmem:[%s3179_s4 + $0x100] sm:$0xff] }
  0x25   : > { %524 = vmatpush.msra.mxu3 %v323_v49  ;;  %505 = vmatpush.msra.mxu2 %v415_v50  ;;  %v443_v15 = vld [vmem:[%s3179_s4 + $0x410] sm:$0xff]  ;;  %v396_v17 = vld [vmem:[%s3179_s4 + $0x298] sm:$0xff]  ;;  %v393_v21 = vld [vmem:[%s3179_s4 + $0x280] sm:$0xff] }
  0x26   : > { %485 = vmatpush.msra.mxu1 %v367_v51  ;;  %463 = vmatpush.msra.mxu0 %v325_v52  ;;  %v392_v18 = vld [vmem:[%s3179_s4 + $0x278] sm:$0xff]  ;;  %v389_v22 = vld [vmem:[%s3179_s4 + $0x260] sm:$0xff]  ;;  %v342_v24 = vld [vmem:[%s3179_s4 + $0xe8] sm:$0xff] }
  0x27   : > { %525 = vmatpush.msra.mxu3 %v320_v53  ;;  %506 = vmatpush.msra.mxu2 %v412_v54  ;;  %v440_v19 = vld [vmem:[%s3179_s4 + $0x3f8] sm:$0xff]  ;;  %v437_v23 = vld [vmem:[%s3179_s4 + $0x3e0] sm:$0xff]  ;;  %v390_v25 = vld [vmem:[%s3179_s4 + $0x268] sm:$0xff] }
  0x28   : > { %486 = vmatpush.msra.mxu1 %v364_v55  ;;  %464 = vmatpush.msra.mxu0 %v322_v56  ;;  %v386_v26 = vld [vmem:[%s3179_s4 + $0x248] sm:$0xff]  ;;  %v339_v28 = vld [vmem:[%s3179_s4 + $0xd0] sm:$0xff]  ;;  %v336_v32 = vld [vmem:[%s3179_s4 + $0xb8] sm:$0xff] }
  0x29   : > { %526 = vmatpush.msra.mxu3 %v317_v57  ;;  %507 = vmatpush.msra.mxu2 %v409_v58  ;;  %v434_v27 = vld [vmem:[%s3179_s4 + $0x3c8] sm:$0xff]  ;;  %v387_v29 = vld [vmem:[%s3179_s4 + $0x250] sm:$0xff]  ;;  %v384_v33 = vld [vmem:[%s3179_s4 + $0x238] sm:$0xff] }
  0x2a   : > { %487 = vmatpush.msra.mxu1 %v361_v59  ;;  %465 = vmatpush.msra.mxu0 %v319_v0  ;;  %v383_v30 = vld [vmem:[%s3179_s4 + $0x230] sm:$0xff]  ;;  %v380_v34 = vld [vmem:[%s3179_s4 + $0x218] sm:$0xff]  ;;  %v333_v36 = vld [vmem:[%s3179_s4 + $0xa0] sm:$0xff] }
  0x2b   : > { %532 = vmatpush.msrb.mxu2 %v407_v60  ;;  %527 = vmatpush.msra.mxu3 %v314_v61  ;;  %v431_v31 = vld [vmem:[%s3179_s4 + $0x3b0] sm:$0xff]  ;;  %v428_v35 = vld [vmem:[%s3179_s4 + $0x398] sm:$0xff]  ;;  %v381_v37 = vld [vmem:[%s3179_s4 + $0x220] sm:$0xff] }
  0x2c   : > { %572 = vmatpush.msrb.mxu1 %v360_v62  ;;  %466 = vmatpush.msra.mxu0 %v316_v5  ;;  %v425_v38 = vld [vmem:[%s3179_s4 + $0x380] sm:$0xff]  ;;  %v330_v39 = vld [vmem:[%s3179_s4 + $0x88] sm:$0xff]  ;;  %v327_v43 = vld [vmem:[%s3179_s4 + $0x70] sm:$0xff] }
  0x2d   : > { %592 = vmatpush.msrb.mxu3 %v408_v63  ;;  %533 = vmatpush.msrb.mxu2 %v404_v1  ;;  %v378_v40 = vld [vmem:[%s3179_s4 + $0x208] sm:$0xff]  ;;  %v375_v44 = vld [vmem:[%s3179_s4 + $0x1f0] sm:$0xff]  ;;  %v324_v47 = vld [vmem:[%s3179_s4 + $0x58] sm:$0xff] }
  0x2e   : > { %573 = vmatpush.msrb.mxu1 %v357_v2  ;;  %467 = vmatpush.msra.mxu0 %v313_v9  ;;  %v374_v41 = vld [vmem:[%s3179_s4 + $0x1e8] sm:$0xff]  ;;  %v371_v45 = vld [vmem:[%s3179_s4 + $0x1d0] sm:$0xff]  ;;  %v372_v48 = vld [vmem:[%s3179_s4 + $0x1d8] sm:$0xff] }
  0x2f   : > { %593 = vmatpush.msrb.mxu3 %v405_v4  ;;  %534 = vmatpush.msrb.mxu2 %v401_v6  ;;  %v422_v42 = vld [vmem:[%s3179_s4 + $0x368] sm:$0xff]  ;;  %v419_v46 = vld [vmem:[%s3179_s4 + $0x350] sm:$0xff]  ;;  %v368_v49 = vld [vmem:[%s3179_s4 + $0x1b8] sm:$0xff] }
  0x30   : > { %574 = vmatpush.msrb.mxu1 %v354_v7  ;;  %555 = vmatpush.msrb.mxu0 %v446_v11  ;;  %v416_v50 = vld [vmem:[%s3179_s4 + $0x338] sm:$0xff]  ;;  %v321_v51 = vld [vmem:[%s3179_s4 + $0x40] sm:$0xff]  ;;  %v318_v55 = vld [vmem:[%s3179_s4 + $0x28] sm:$0xff] }
  0x31   : > { %594 = vmatpush.msrb.mxu3 %v402_v8  ;;  %535 = vmatpush.msrb.mxu2 %v398_v10  ;;  %v369_v52 = vld [vmem:[%s3179_s4 + $0x1c0] sm:$0xff]  ;;  %v366_v56 = vld [vmem:[%s3179_s4 + $0x1a8] sm:$0xff]  ;;  %v315_v59 = vld [vmem:[%s3179_s4 + $0x10] sm:$0xff] }
  0x32   : > { %575 = vmatpush.msrb.mxu1 %v351_v12  ;;  %556 = vmatpush.msrb.mxu0 %v443_v15  ;;  %v365_v53 = vld [vmem:[%s3179_s4 + $0x1a0] sm:$0xff]  ;;  %v362_v57 = vld [vmem:[%s3179_s4 + $0x188] sm:$0xff]  ;;  %v363_v60 = vld [vmem:[%s3179_s4 + $0x190] sm:$0xff] }
  0x33   : > { %595 = vmatpush.msrb.mxu3 %v399_v13  ;;  %536 = vmatpush.msrb.mxu2 %v395_v14  ;;  %v413_v54 = vld [vmem:[%s3179_s4 + $0x320] sm:$0xff]  ;;  %v410_v58 = vld [vmem:[%s3179_s4 + $0x308] sm:$0xff]  ;;  %v683_v62 = vld [vmem:[%s3180_s5 + $0xb0] sm:$0xf] }
  0x34   : > { %576 = vmatpush.msrb.mxu1 %v348_v16  ;;  %557 = vmatpush.msrb.mxu0 %v440_v19  ;;  %v291_v63 = vld [vmem:[%s280_s21] sm:$0xff]  ;;  %v292_v0 = vld [vmem:[%s280_s21 + $0x8] sm:$0xff]  ;;  %v293_v1 = vld [vmem:[%s280_s21 + $0x10] sm:$0xff]  ;;  %v773_v2 = vunpack.c.l.b16 %v683_v62 }
  0x35   : > { %596 = vmatpush.msrb.mxu3 %v396_v17  ;;  %537 = vmatpush.msrb.mxu2 %v392_v18  ;;  %v2237_v15 = vld [vmem:[%s3180_s5 + $0x38] sm:$0xff]  ;;  %v447_v16 = vld [vmem:[%s3179_s4 + $0x430] sm:$0xff] }
  0x36   : > { %577 = vmatpush.msrb.mxu1 %v345_v20  ;;  %558 = vmatpush.msrb.mxu0 %v437_v23  ;;  %v796_v11 = vpack.c.b16 %v773_v2, %v773_v2  ;;  %v2245_v17 = vld [vmem:[%s3180_s5 + $0x78] sm:$0xff]  ;;  %v2236_v20 = vld [vmem:[%s3180_s5 + $0x30] sm:$0xff]  ;;  %v2251_v23 = vld [vmem:[%s3180_s5 + $0xa8] sm:$0xff] }
  0x37   : > { %597 = vmatpush.msrb.mxu3 %v393_v21  ;;  %538 = vmatpush.msrb.mxu2 %v389_v22  ;;  %v444_v19 = vld [vmem:[%s3179_s4 + $0x418] sm:$0xff]  ;;  %v441_v21 = vld [vmem:[%s3179_s4 + $0x400] sm:$0xff]  ;;  %v2244_v22 = vld [vmem:[%s3180_s5 + $0x70] sm:$0xff] }
  0x38   : > { %578 = vmatpush.msrb.mxu1 %v342_v24  ;;  %559 = vmatpush.msrb.mxu0 %v434_v27  ;;  %v824_v18 = vsel %vm822_vm0, %v796_v11, 0  ;;  %v438_v24 = vld [vmem:[%s3179_s4 + $0x3e8] sm:$0xff]  ;;  %v2257_v62 = vld [vmem:[%s3180_s5 + $0xdc] sm:$0xff] }
  0x39   : > { %598 = vmatpush.msrb.mxu3 %v390_v25  ;;  %539 = vmatpush.msrb.mxu2 %v386_v26  ;;  %v435_v25 = vld [vmem:[%s3179_s4 + $0x3d0] sm:$0xff]  ;;  %v2235_v26 = vld [vmem:[%s3180_s5 + $0x28] sm:$0xff] }
  0x3a   : > { %579 = vmatpush.msrb.mxu1 %v339_v28  ;;  %560 = vmatpush.msrb.mxu0 %v431_v31  ;;  %v2243_v27 = vld [vmem:[%s3180_s5 + $0x68] sm:$0xff]  ;;  %v2250_v28 = vld [vmem:[%s3180_s5 + $0xa0] sm:$0xff] }
  0x3b   : > { %599 = vmatpush.msrb.mxu3 %v387_v29  ;;  %540 = vmatpush.msrb.mxu2 %v383_v30  ;;  %v432_v29 = vld [vmem:[%s3179_s4 + $0x3b8] sm:$0xff]  ;;  %v429_v30 = vld [vmem:[%s3179_s4 + $0x3a0] sm:$0xff]  ;;  %v2271_v2 = vld [vmem:[%s3180_s5 + $0x14c] sm:$0xff] }
  0x3c   : > { %580 = vmatpush.msrb.mxu1 %v336_v32  ;;  %2331 = vset.pattern.permute.xlu1 %v2341_v3  ;;  %v2234_v31 = vld [vmem:[%s3180_s5 + $0x20] sm:$0xff] }
  0x3d   : > { %600 = vmatpush.msrb.mxu3 %v384_v33  ;;  %2332 = vset.pattern.permute.xlu0 %v2341_v3  ;;  %v377_v3 = vld [vmem:[%s3179_s4 + $0x200] sm:$0xff]  ;;  %v2249_v33 = vld [vmem:[%s3180_s5 + $0x98] sm:$0xff] }
  0x3e   : > { %541 = vmatpush.msrb.mxu2 %v380_v34  ;;  %561 = vmatpush.msrb.mxu0 %v428_v35  ;;  %v2242_v32 = vld [vmem:[%s3180_s5 + $0x60] sm:$0xff]  ;;  %v426_v34 = vld [vmem:[%s3179_s4 + $0x388] sm:$0xff]  ;;  %v423_v35 = vld [vmem:[%s3179_s4 + $0x370] sm:$0xff] }
  0x3f   : > { %581 = vmatpush.msrb.mxu1 %v333_v36  ;;  %601 = vmatpush.msrb.mxu3 %v381_v37  ;;  %v2233_v36 = vld [vmem:[%s3180_s5 + $0x18] sm:$0xff]  ;;  %v2262_v11 = vld [vmem:[%s3180_s5 + $0x104] sm:$0xff] }
  0x40   : > { %542 = vmatpush.msrb.mxu2 %v377_v3  ;;  %562 = vmatpush.msrb.mxu0 %v425_v38  ;;  %v2241_v37 = vld [vmem:[%s3180_s5 + $0x58] sm:$0xff]  ;;  %v1863_v3 = vld [vmem:[%s3180_s5 + $0x164] sm:$0xf]  ;;  %v2248_v38 = vld [vmem:[%s3180_s5 + $0x90] sm:$0xff] }
  0x41   : > { %582 = vmatpush.msrb.mxu1 %v330_v39  ;;  %602 = vmatpush.msrb.mxu3 %v378_v40  ;;  %v420_v39 = vld [vmem:[%s3179_s4 + $0x358] sm:$0xff]  ;;  %v1002_v40 = vunpack.c.l.b16 %v1863_v3 }
  0x42   : > { %543 = vmatpush.msrb.mxu2 %v374_v41  ;;  %563 = vmatpush.msrb.mxu0 %v422_v42  ;;  %v417_v41 = vld [vmem:[%s3179_s4 + $0x340] sm:$0xff]  ;;  %v2232_v42 = vld [vmem:[%s3180_s5 + $0x10] sm:$0xff] }
  0x43   : > { %583 = vmatpush.msrb.mxu1 %v327_v43  ;;  %603 = vmatpush.msrb.mxu3 %v375_v44  ;;  %v2240_v43 = vld [vmem:[%s3180_s5 + $0x50] sm:$0xff]  ;;  %v2247_v44 = vld [vmem:[%s3180_s5 + $0x88] sm:$0xff] }
  0x44   : > { %544 = vmatpush.msrb.mxu2 %v371_v45  ;;  %564 = vmatpush.msrb.mxu0 %v419_v46  ;;  %v414_v45 = vld [vmem:[%s3179_s4 + $0x328] sm:$0xff]  ;;  %v1025_v46 = vpack.c.b16 %v1002_v40, %v1002_v40 }
  0x45   : > { %584 = vmatpush.msrb.mxu1 %v324_v47  ;;  %604 = vmatpush.msrb.mxu3 %v372_v48  ;;  %v411_v47 = vld [vmem:[%s3179_s4 + $0x310] sm:$0xff]  ;;  %v2231_v48 = vld [vmem:[%s3180_s5 + $0x8] sm:$0xff] }
  0x46   : > { %545 = vmatpush.msrb.mxu2 %v368_v49  ;;  %565 = vmatpush.msrb.mxu0 %v416_v50  ;;  %v2239_v49 = vld [vmem:[%s3180_s5 + $0x48] sm:$0xff]  ;;  %v2246_v50 = vld [vmem:[%s3180_s5 + $0x80] sm:$0xff] }
  0x47   : > { %585 = vmatpush.msrb.mxu1 %v321_v51  ;;  %605 = vmatpush.msrb.mxu3 %v369_v52  ;;  %v2259_v51 = vld [vmem:[%s3180_s5 + $0xec] sm:$0xff]  ;;  %v1049_v52 = vsel %vm822_vm0, %v1025_v46, 0  ;;  %v2317_v46 = vld [vmem:[%s3180_s5 + $0x2c4] sm:$0xff] }
  0x48   : > { %546 = vmatpush.msrb.mxu2 %v365_v53  ;;  %566 = vmatpush.msrb.mxu0 %v413_v54  ;;  %v2230_v53 = vld [vmem:[%s3180_s5] sm:$0xff]  ;;  %v2282_v40 = vld [vmem:[%s3180_s5 + $0x1a8] sm:$0xff] }
  0x49   : > { %586 = vmatpush.msrb.mxu1 %v318_v55  ;;  %606 = vmatpush.msrb.mxu3 %v366_v56  ;;  %v2238_v54 = vld [vmem:[%s3180_s5 + $0x40] sm:$0xff]  ;;  %v2267_v55 = vld [vmem:[%s3180_s5 + $0x12c] sm:$0xff] }
  0x4a   : > { %547 = vmatpush.msrb.mxu2 %v362_v57  ;;  %567 = vmatpush.msrb.mxu0 %v410_v58  ;;  %v2258_v57 = vld [vmem:[%s3180_s5 + $0xe4] sm:$0xff]  ;;  %v2273_v58 = vld [vmem:[%s3180_s5 + $0x15c] sm:$0xff] }
  0x4b   : > { %587 = vmatpush.msrb.mxu1 %v315_v59  ;;  %607 = vmatpush.msrb.mxu3 %v363_v60  ;;  %v2266_v60 = vld [vmem:[%s3180_s5 + $0x124] sm:$0xff] }
  0x7f   : > { %v298_v61 = vpop.permute.xlu0 %297 }
  0x80   : > { %v300_v4 = vmul.f32 %v298_v61, %v291_v63  ;;  %v301_v5 = vmul.f32 %v298_v61, %v292_v0  ;;  %v302_v6 = vmul.f32 %v298_v61, %v293_v1  ;;  %v2272_v63 = vld [vmem:[%s3180_s5 + $0x154] sm:$0xff]  ;;  %v2265_v0 = vld [vmem:[%s3180_s5 + $0x11c] sm:$0xff] }
  0x81   : > { %v2256_v1 = vld [vmem:[%s3180_s5 + $0xd4] sm:$0xff] }
  0x88   : > { %v305_v7 = vpop.permute.xlu0 %304 }
  0x89   : > { %v307_v8 = vadd.f32 %v305_v7, %v300_v4  ;;  %v308_v9 = vadd.f32 %v305_v7, %v301_v5  ;;  %v309_v10 = vadd.f32 %v305_v7, %v302_v6  ;;  %v2264_v4 = vld [vmem:[%s3180_s5 + $0x114] sm:$0xff]  ;;  %v2255_v5 = vld [vmem:[%s3180_s5 + $0xcc] sm:$0xff]  ;;  %v2270_v6 = vld [vmem:[%s3180_s5 + $0x144] sm:$0xff] }
  0x8a   : > { %v2263_v7 = vld [vmem:[%s3180_s5 + $0x10c] sm:$0xff] }
  0x8b   : > { %v2778_v12 = vmax.f32 %v307_v8, 0.0  ;;  %v2780_v13 = vmax.f32 %v308_v9, 0.0  ;;  %v2782_v14 = vmax.f32 %v309_v10, 0.0  ;;  %v2254_v8 = vld [vmem:[%s3180_s5 + $0xc4] sm:$0xff]  ;;  %v2269_v9 = vld [vmem:[%s3180_s5 + $0x13c] sm:$0xff] }
  0x8c   : > { %v2000_v10 = vld [vmem:[%s3180_s5 + $0x218] sm:$0xf] }
  0x8d   : > { %468 = vmatmul.f32.vlgmr.msra.gmra.mxu0 %v2778_v12  ;;  %488 = vmatmul.f32.vlgmr.msra.gmra.mxu1 %v2780_v13  ;;  %v2914_v56 = vpack.c.bf16 %v2782_v14, %v2782_v14  ;;  %v2926_v59 = vpack.c.bf16 %v2778_v12, %v2778_v12  ;;  %v2933_v61 = vpack.c.bf16 %v2780_v13, %v2780_v13 }
  0x8e   : > { %1727 = vmatmul.msk.f32.vlgmr.msra.gmra.mxu2 %vm448_vm1, %v2782_v14  ;;  %528 = vmatmul.f32.vlgmr.msra.gmra.mxu3 %v2778_v12 }
  0x8f   : > { %615 = vmatpush.msra.mxu0 %v447_v16  ;;  %826 = vmatpush.bf16.msra.mxu2 %v2237_v15  ;;  %v1267_v15 = vunpack.c.l.b16 %v2000_v10  ;;  %v2261_v16 = vld [vmem:[%s3180_s5 + $0xfc] sm:$0xff] }
  0x90   : > { %839 = vmatpush.bf16.msra.mxu1 %v2245_v17  ;;  %853 = vmatpush.bf16.msra.mxu3 %v824_v18  ;;  %v2252_v17 = vld [vmem:[%s3180_s5 + $0xb4] sm:$0xff]  ;;  %v2281_v18 = vld [vmem:[%s3180_s5 + $0x1a0] sm:$0xff] }
  0x91   : > { %616 = vmatpush.msra.mxu0 %v444_v19  ;;  %v2288_v19 = vld [vmem:[%s3180_s5 + $0x1d8] sm:$0xff] }
  0x93   : > { %617 = vmatpush.msra.mxu0 %v441_v21  ;;  %827 = vmatpush.bf16.msra.mxu2 %v2236_v20  ;;  %v1290_v20 = vpack.c.b16 %v1267_v15, %v1267_v15  ;;  %v2260_v21 = vld [vmem:[%s3180_s5 + $0xf4] sm:$0xff] }
  0x94   : > { %840 = vmatpush.bf16.msra.mxu1 %v2244_v22  ;;  %854 = vmatpush.bf16.msra.mxu3 %v2251_v23  ;;  %v2280_v22 = vld [vmem:[%s3180_s5 + $0x198] sm:$0xff]  ;;  %v2287_v23 = vld [vmem:[%s3180_s5 + $0x1d0] sm:$0xff] }
  0x95   : > { %618 = vmatpush.msra.mxu0 %v438_v24  ;;  %588 = vmatmul.f32.vlgmr.msrb.gmra.mxu1 %v2778_v12  ;;  %v2253_v12 = vld [vmem:[%s3180_s5 + $0xbc] sm:$0xff]  ;;  %v1314_v24 = vsel %vm822_vm0, %v1290_v20, 0 }
  0x96   : > { %548 = vmatmul.f32.vlgmr.msrb.gmra.mxu2 %v2780_v13  ;;  %1728 = vmatmul.msk.f32.vlgmr.msrb.gmra.mxu0 %vm448_vm1, %v2782_v14 }
  0x97   : > { %608 = vmatmul.f32.vlgmr.msrb.gmra.mxu3 %v2780_v13  ;;  %619 = vmatpush.msra.mxu0 %v435_v25  ;;  %v2268_v13 = vld [vmem:[%s3180_s5 + $0x134] sm:$0xff] }
  0x98   : > { %828 = vmatpush.bf16.msra.mxu2 %v2235_v26  ;;  %841 = vmatpush.bf16.msra.mxu1 %v2243_v27  ;;  %v2295_v25 = vld [vmem:[%s3180_s5 + $0x210] sm:$0xff]  ;;  %v2286_v27 = vld [vmem:[%s3180_s5 + $0x1c8] sm:$0xff] }
  0x99   : > { %855 = vmatpush.bf16.msra.mxu3 %v2250_v28  ;;  %620 = vmatpush.msra.mxu0 %v432_v29  ;;  %v2279_v26 = vld [vmem:[%s3180_s5 + $0x190] sm:$0xff]  ;;  %v2294_v28 = vld [vmem:[%s3180_s5 + $0x208] sm:$0xff] }
  0x9a   : > { %v2278_v29 = vld [vmem:[%s3180_s5 + $0x188] sm:$0xff] }
  0x9b   : > { %621 = vmatpush.msra.mxu0 %v429_v30  ;;  %v2285_v30 = vld [vmem:[%s3180_s5 + $0x1c0] sm:$0xff] }
  0x9c   : > { %829 = vmatpush.bf16.msra.mxu2 %v2234_v31  ;;  %842 = vmatpush.bf16.msra.mxu1 %v2242_v32  ;;  %v2293_v31 = vld [vmem:[%s3180_s5 + $0x200] sm:$0xff] }
  0x9d   : > { %856 = vmatpush.bf16.msra.mxu3 %v2249_v33  ;;  %622 = vmatpush.msra.mxu0 %v426_v34  ;;  %v2277_v32 = vld [vmem:[%s3180_s5 + $0x180] sm:$0xff]  ;;  %v2284_v33 = vld [vmem:[%s3180_s5 + $0x1b8] sm:$0xff]  ;;  %v2136_v34 = vld [vmem:[%s3180_s5 + $0x2cc] sm:$0xf] }
  0x9e   : > { %v1513_v3 = vunpack.c.l.b16 %v2136_v34 }
  0x9f   : > { %623 = vmatpush.msra.mxu0 %v423_v35  ;;  %v2292_v35 = vld [vmem:[%s3180_s5 + $0x1f8] sm:$0xff] }
  0xa0   : > { %830 = vmatpush.bf16.msra.mxu2 %v2233_v36  ;;  %843 = vmatpush.bf16.msra.mxu1 %v2241_v37  ;;  %v2276_v36 = vld [vmem:[%s3180_s5 + $0x178] sm:$0xff]  ;;  %v2283_v37 = vld [vmem:[%s3180_s5 + $0x1b0] sm:$0xff] }
  0xa1   : > { %857 = vmatpush.bf16.msra.mxu3 %v2248_v38  ;;  %624 = vmatpush.msra.mxu0 %v420_v39  ;;  %v2291_v38 = vld [vmem:[%s3180_s5 + $0x1f0] sm:$0xff] }
  0xa2   : > { %v2275_v39 = vld [vmem:[%s3180_s5 + $0x170] sm:$0xff] }
  0xa3   : > { %625 = vmatpush.msra.mxu0 %v417_v41  ;;  %v1536_v41 = vpack.c.b16 %v1513_v3, %v1513_v3 }
  0xa4   : > { %831 = vmatpush.bf16.msra.mxu2 %v2232_v42  ;;  %844 = vmatpush.bf16.msra.mxu1 %v2240_v43  ;;  %v2290_v42 = vld [vmem:[%s3180_s5 + $0x1e8] sm:$0xff] }
  0xa5   : > { %858 = vmatpush.bf16.msra.mxu3 %v2247_v44  ;;  %626 = vmatpush.msra.mxu0 %v414_v45  ;;  %v2274_v43 = vld [vmem:[%s3180_s5 + $0x168] sm:$0xff]  ;;  %v2311_v44 = vld [vmem:[%s3180_s5 + $0x294] sm:$0xff]  ;;  %v1560_v45 = vsel %vm822_vm0, %v1536_v41, 0 }
  0xa7   : > { %627 = vmatpush.msra.mxu0 %v411_v47  ;;  %v2310_v47 = vld [vmem:[%s3180_s5 + $0x28c] sm:$0xff] }
  0xa8   : > { %832 = vmatpush.bf16.msra.mxu2 %v2231_v48  ;;  %845 = vmatpush.bf16.msra.mxu1 %v2239_v49  ;;  %v2316_v48 = vld [vmem:[%s3180_s5 + $0x2bc] sm:$0xff]  ;;  %v2309_v49 = vld [vmem:[%s3180_s5 + $0x284] sm:$0xff] }
  0xa9   : > { %859 = vmatpush.bf16.msra.mxu3 %v2246_v50  ;;  %1729 = vmatmul.msk.f32.vlgmr.msra.gmra.mxu0 %vm448_vm1, %v2782_v14  ;;  %v2289_v14 = vld [vmem:[%s3180_s5 + $0x1e0] sm:$0xff]  ;;  %v2315_v50 = vld [vmem:[%s3180_s5 + $0x2b4] sm:$0xff] }
  0xaa   : > { %1051 = vmatpush.bf16.msrb.mxu0 %v2259_v51  ;;  %v2308_v51 = vld [vmem:[%s3180_s5 + $0x27c] sm:$0xff] }
  0xac   : > { %1818 = vmatmul.msk.bf16.vlgmr.msra.gmra.mxu3 %vm448_vm1, %v2914_v56  ;;  %833 = vmatpush.bf16.msra.mxu2 %v2230_v53  ;;  %v2307_v53 = vld [vmem:[%s3180_s5 + $0x274] sm:$0xff] }
  0xad   : > { %1078 = vmatpush.bf16.msrb.mxu3 %v1049_v52  ;;  %846 = vmatpush.bf16.msra.mxu1 %v2238_v54  ;;  %v2314_v52 = vld [vmem:[%s3180_s5 + $0x2ac] sm:$0xff]  ;;  %v2313_v54 = vld [vmem:[%s3180_s5 + $0x2a4] sm:$0xff] }
  0xae   : > { %1052 = vmatpush.bf16.msrb.mxu0 %v2258_v57  ;;  %v2312_v57 = vld [vmem:[%s3180_s5 + $0x29c] sm:$0xff] }
  0xaf   : > { %834 = vmatmul.bf16.vlgmr.msra.gmra.mxu2 %v2926_v59 }
  0xb0   : > { %1064 = vmatpush.bf16.msrb.mxu2 %v2267_v55  ;;  %847 = vmatmul.bf16.vlgmr.msra.gmra.mxu1 %v2933_v61  ;;  %v2306_v55 = vld [vmem:[%s3180_s5 + $0x26c] sm:$0xff] }
  0xb1   : > { %1079 = vmatpush.bf16.msrb.mxu3 %v2273_v58  ;;  %v2305_v58 = vld [vmem:[%s3180_s5 + $0x264] sm:$0xff] }
  0xb2   : > { %1053 = vmatpush.bf16.msrb.mxu0 %v2257_v62 }
  0xb4   : > { %1065 = vmatpush.bf16.msrb.mxu2 %v2266_v60  ;;  %v2304_v60 = vld [vmem:[%s3180_s5 + $0x25c] sm:$0xff] }
  0xb5   : > { %1080 = vmatpush.bf16.msrb.mxu3 %v2272_v63 }
  0xb6   : > { %1054 = vmatpush.bf16.msrb.mxu0 %v2256_v1 }
  0xb8   : > { %1066 = vmatpush.bf16.msrb.mxu2 %v2265_v0 }
  0xb9   : > { %1081 = vmatpush.bf16.msrb.mxu3 %v2271_v2 }
  0xba   : > { %1055 = vmatpush.bf16.msrb.mxu0 %v2255_v5 }
  0xbc   : > { %1067 = vmatpush.bf16.msrb.mxu2 %v2264_v4 }
  0xbd   : > { %1082 = vmatpush.bf16.msrb.mxu3 %v2270_v6 }
  0xbe   : > { %1056 = vmatpush.bf16.msrb.mxu0 %v2254_v8 }
  0xc0   : > { %1068 = vmatpush.bf16.msrb.mxu2 %v2263_v7 }
  0xc1   : > { %1083 = vmatpush.bf16.msrb.mxu3 %v2269_v9 }
  0xc2   : > { %1057 = vmatpush.bf16.msrb.mxu0 %v2253_v12 }
  0xc4   : > { %1069 = vmatpush.bf16.msrb.mxu2 %v2262_v11 }
  0xc5   : > { %1084 = vmatpush.bf16.msrb.mxu3 %v2268_v13 }
  0xc6   : > { %1058 = vmatpush.bf16.msrb.mxu0 %v2252_v17 }
  0xc8   : > { %1952 = vmatmul.msk.bf16.vlgmr.msrb.gmra.mxu3 %vm448_vm1, %v2914_v56  ;;  %1070 = vmatpush.bf16.msrb.mxu2 %v2261_v16 }
  0xc9   : > { %1329 = vmatpush.bf16.msra.mxu3 %v2289_v14  ;;  %1059 = vmatmul.bf16.vlgmr.msrb.gmra.mxu0 %v2926_v59 }
  0xca   : > { %1316 = vmatpush.bf16.msra.mxu0 %v2281_v18 }
  0xcc   : > { %1071 = vmatpush.bf16.msrb.mxu2 %v2260_v21 }
  0xcd   : > { %1330 = vmatpush.bf16.msra.mxu3 %v2288_v19 }
  0xce   : > { %1317 = vmatpush.bf16.msra.mxu0 %v2280_v22 }
  0xcf   : > { %1072 = vmatmul.bf16.vlgmr.msrb.gmra.mxu2 %v2933_v61 }
  0xd0   : > { %1343 = vmatpush.bf16.msra.mxu2 %v1314_v24 }
  0xd1   : > { %1331 = vmatpush.bf16.msra.mxu3 %v2287_v23 }
  0xd2   : > { %1318 = vmatpush.bf16.msra.mxu0 %v2279_v26 }
  0xd4   : > { %1344 = vmatpush.bf16.msra.mxu2 %v2295_v25 }
  0xd5   : > { %1332 = vmatpush.bf16.msra.mxu3 %v2286_v27 }
  0xd6   : > { %1319 = vmatpush.bf16.msra.mxu0 %v2278_v29 }
  0xd8   : > { %1345 = vmatpush.bf16.msra.mxu2 %v2294_v28 }
  0xd9   : > { %1333 = vmatpush.bf16.msra.mxu3 %v2285_v30 }
  0xda   : > { %1320 = vmatpush.bf16.msra.mxu0 %v2277_v32  ;;  %v1953_v32 = vld [vmem:[%s3177_s2 + $0x4] sm:$0xf] }
  0xdc   : > { %1346 = vmatpush.bf16.msra.mxu2 %v2293_v31 }
  0xdd   : > { %1334 = vmatpush.bf16.msra.mxu3 %v2284_v33 }
  0xde   : > { %1321 = vmatpush.bf16.msra.mxu0 %v2276_v36  ;;  %v865_v36 = vld [vmem:[%s3177_s2] sm:$0xf] }
  0xe0   : > { %1347 = vmatpush.bf16.msra.mxu2 %v2292_v35 }
  0xe1   : > { %1335 = vmatpush.bf16.msra.mxu3 %v2283_v37 }
  0xe2   : > { %1322 = vmatpush.bf16.msra.mxu0 %v2275_v39 }
  0xe4   : > { %1348 = vmatpush.bf16.msra.mxu2 %v2291_v38 }
  0xe5   : > { %1336 = vmatpush.bf16.msra.mxu3 %v2282_v40  ;;  %v2303_v40 = vld [vmem:[%s3180_s5 + $0x254] sm:$0xff] }
  0xe6   : > { %1323 = vmatpush.bf16.msra.mxu0 %v2274_v43  ;;  %v2302_v43 = vld [vmem:[%s3180_s5 + $0x24c] sm:$0xff] }
  0xe8   : > { %1337 = vmatmul.bf16.vlgmr.msra.gmra.mxu3 %v2933_v61  ;;  %1349 = vmatpush.bf16.msra.mxu2 %v2290_v42 }
  0xe9   : > { %1324 = vmatmul.bf16.vlgmr.msra.gmra.mxu0 %v2926_v59 }
  0xea   : > { %1575 = vmatpush.bf16.msrb.mxu0 %v2311_v44 }
  0xeb   : > { %2089 = vmatmul.msk.bf16.vlgmr.msra.gmra.mxu2 %vm448_vm1, %v2914_v56 }
  0xec   : > { %1589 = vmatpush.bf16.msrb.mxu2 %v1560_v45  ;;  %v2301_v45 = vld [vmem:[%s3180_s5 + $0x244] sm:$0xff] }
  0xee   : > { %1576 = vmatpush.bf16.msrb.mxu0 %v2310_v47  ;;  %v2300_v47 = vld [vmem:[%s3180_s5 + $0x23c] sm:$0xff] }
  0xf0   : > { %1590 = vmatpush.bf16.msrb.mxu2 %v2317_v46  ;;  %v2090_v46 = vld [vmem:[%s3177_s2 + $0x8] sm:$0xf] }
  0xf2   : > { %1577 = vmatpush.bf16.msrb.mxu0 %v2309_v49  ;;  %v2298_v49 = vld [vmem:[%s3180_s5 + $0x22c] sm:$0xff] }
  0xf4   : > { %1591 = vmatpush.bf16.msrb.mxu2 %v2316_v48  ;;  %v2299_v48 = vld [vmem:[%s3180_s5 + $0x234] sm:$0xff] }
  0xf6   : > { %1578 = vmatpush.bf16.msrb.mxu0 %v2308_v51 }
  0xf8   : > { %1592 = vmatpush.bf16.msrb.mxu2 %v2315_v50 }
  0xfa   : > { %1579 = vmatpush.bf16.msrb.mxu0 %v2307_v53  ;;  %v2296_v53 = vld [vmem:[%s3180_s5 + $0x21c] sm:$0xff] }
  0xfc   : > { %1593 = vmatpush.bf16.msrb.mxu2 %v2314_v52  ;;  %v2297_v52 = vld [vmem:[%s3180_s5 + $0x224] sm:$0xff] }
  0xfe   : > { %1580 = vmatpush.bf16.msrb.mxu0 %v2306_v55 }
 0x100   : > { %1594 = vmatpush.bf16.msrb.mxu2 %v2313_v54 }
 0x102   : > { %1581 = vmatpush.bf16.msrb.mxu0 %v2305_v58 }
 0x104   : > { %1595 = vmatpush.bf16.msrb.mxu2 %v2312_v57 }
 0x106   : > { %1582 = vmatpush.bf16.msrb.mxu0 %v2304_v60 }
 0x107   : > { %2225 = vmatmul.msk.bf16.vlgmr.msrb.gmra.mxu2 %vm448_vm1, %v2914_v56 }
 0x109   : > { %1583 = vmatmul.bf16.vlgmr.msrb.gmra.mxu0 %v2933_v61 }
 0x10a   : > { %v469_v62 = vpop.f32.mrf.mxu0  ;;  %v489_v63 = vpop.f32.mrf.mxu1 }
 0x10b   : > { %v490_v0 = vadd.f32 %v489_v63, %v469_v62 }
 0x111   : > { %v509_v1 = vpop.f32.mrf.mxu2  ;;  %v529_v4 = vpop.f32.mrf.mxu3 }
 0x112   : > { %v510_v2 = vadd.f32 %v509_v1, %v490_v0  ;;  %v589_v9 = vpop.f32.mrf.mxu1  ;;  %v1624_v0 = vld [vmem:[%s3178_s3] sm:$0xff] }
 0x113   : > { %v569_v7 = vpop.f32.mrf.mxu0  ;;  %1627 = vperm.xlu1 %2331, %v1624_v0  }
 0x114   : > { %632 = vst [vmem:[%s285_s17] sm:$0xff] %v510_v2 }
 0x119   : > { %v549_v5 = vpop.f32.mrf.mxu2 }
 0x11a   : > { %v550_v6 = vadd.f32 %v549_v5, %v529_v4  ;;  %v609_v56 = vpop.f32.mrf.mxu3 }
 0x11b   : > { %v610_v61 = vadd.f32 %v609_v56, %v589_v9  ;;  %v2226_v9 = vld [vmem:[%s3177_s2 + $0xc] sm:$0xf] }
 0x11c   : > { %v570_v8 = vadd.f32 %v569_v7, %v550_v6 }
 0x11e   : > { %633 = vst [vmem:[%s285_s17 + $0x8] sm:$0xff] %v570_v8 }
 0x126   : > { %v629_v10 = vpop.f32.mrf.mxu0 }
 0x127   : > { %v630_v11 = vadd.f32 %v629_v10, %v610_v61 }
 0x129   : > { %635 = vst.msk [vmem:[%s285_s17 + $0x10] sm:$0xff] %vm634_vm2, %v630_v11 }
 0x12d   : > { %v848_v12 = vpop.f32.mrf.mxu1 }
 0x12f   : > { %v861_v13 = vpop.f32.mrf.mxu3 }
 0x132   : > { %v835_v14 = vpop.f32.mrf.mxu2 }
 0x133   : > { %v849_v20 = vadd.f32 %v848_v12, %v835_v14 }
 0x135   : > { %v850_v15 = vpop.f32.mrf.mxu1  ;;  %v862_v22 = vadd.f32 %v861_v13, %v849_v20 }
 0x137   : > { %v863_v16 = vpop.f32.mrf.mxu3  ;;  %v866_v27 = vpack.c.bf16 %v862_v22, %v862_v22 }
 0x139   : > { %v1117_v31 = vsel %vm822_vm0, %v866_v27, 0 }
 0x13a   : > { %v837_v17 = vpop.f32.mrf.mxu2 }
 0x146   : > { %v1060_v18 = vpop.f32.mrf.mxu0 }
 0x14b   : > { %v1086_v19 = vpop.f32.mrf.mxu3 }
 0x14e   : > { %v1062_v21 = vpop.f32.mrf.mxu0 }
 0x152   : > { %v1073_v23 = vpop.f32.mrf.mxu2 }
 0x153   : > { %v1074_v24 = vadd.f32 %v1073_v23, %v1060_v18  ;;  %v1088_v25 = vpop.f32.mrf.mxu3 }
 0x155   : > { %v1087_v26 = vadd.f32 %v1086_v19, %v1074_v24 }
 0x157   : > { %v1092_v28 = vpack.c.bf16 %v1087_v26, %v1087_v26 }
 0x159   : > { %v1098_v29 = vsel %vm822_vm0, %v1092_v28, 0 }
 0x15a   : > { %v1075_v30 = vpop.f32.mrf.mxu2  ;;  %1107 = vmatpush.bf16.msrb.mxu1 %v1098_v29 }
 0x15d   : > { %1954 = vmatmul.msk.bf16.vlgmr.msrb.gmra.mxu1 %vm1093_vm3, %v1953_v32 }
 0x15e   : > { %1126 = vmatpush.bf16.msra.mxu1 %v1117_v31 }
 0x166   : > { %v1325_v33 = vpop.f32.mrf.mxu0 }
 0x16b   : > { %v1338_v34 = vpop.f32.mrf.mxu3 }
 0x16c   : > { %v1339_v35 = vadd.f32 %v1338_v34, %v1325_v33 }
 0x16d   : > { %1955 = vmatmul.msk.bf16.vlgmr.msra.gmra.mxu1 %vm1093_vm3, %v865_v36 }
 0x16e   : > { %v1351_v37 = vpop.f32.mrf.mxu2  ;;  %v1327_v39 = vpop.f32.mrf.mxu0 }
 0x16f   : > { %v1352_v3 = vadd.f32 %v1351_v37, %v1339_v35 }
 0x171   : > { %v1357_v38 = vpack.c.bf16 %v1352_v3, %v1352_v3 }
 0x173   : > { %v1362_v41 = vsel %vm822_vm0, %v1357_v38, 0  ;;  %v1340_v42 = vpop.f32.mrf.mxu3 }
 0x174   : > { %1371 = vmatpush.bf16.msrb.mxu1 %v1362_v41 }
 0x176   : > { %v1353_v44 = vpop.f32.mrf.mxu2 }
 0x178   : > { %1562 = vmatpush.bf16.msra.mxu1 %v2303_v40 }
 0x17c   : > { %1563 = vmatpush.bf16.msra.mxu1 %v2302_v43 }
 0x17d   : > { %2091 = vmatmul.msk.bf16.vlgmr.msrb.gmra.mxu1 %vm1093_vm3, %v2090_v46 }
 0x180   : > { %1564 = vmatpush.bf16.msra.mxu1 %v2301_v45 }
 0x184   : > { %1565 = vmatpush.bf16.msra.mxu1 %v2300_v47 }
 0x185   : > { %v1628_v10 = vpop.permute.xlu1 %1627 }
 0x186   : > { %v1584_v50 = vpop.f32.mrf.mxu0 }
 0x188   : > { %1566 = vmatpush.bf16.msra.mxu1 %v2299_v48 }
 0x18a   : > { %v1597_v51 = vpop.f32.mrf.mxu2 }
 0x18c   : > { %1567 = vmatpush.bf16.msra.mxu1 %v2298_v49 }
 0x18e   : > { %v1586_v54 = vpop.f32.mrf.mxu0 }
 0x190   : > { %1568 = vmatpush.bf16.msra.mxu1 %v2297_v52 }
 0x192   : > { %v1599_v55 = vpop.f32.mrf.mxu2 }
 0x194   : > { %1569 = vmatpush.bf16.msra.mxu1 %v2296_v53 }
 0x197   : > { %1570 = vmatmul.bf16.vlgmr.msra.gmra.mxu1 %v2926_v59 }
 0x1da   : > { %v1109_v57 = vpop.f32.mrf.mxu1 }
 0x1e2   : > { %v1111_v58 = vpop.f32.mrf.mxu1 }
 0x1ea   : > { %v1128_v60 = vpop.f32.mrf.mxu1 }
 0x1eb   : > { %v1129_v62 = vadd.f32 %v1128_v60, %v1109_v57 }
 0x1f2   : > { %v1130_v63 = vpop.f32.mrf.mxu1 }
 0x1fa   : > { %v1373_v1 = vpop.f32.mrf.mxu1 }
 0x1fb   : > { %v1377_v2 = vadd.f32 %v1373_v1, %v1129_v62 }
 0x202   : > { %v1375_v4 = vpop.f32.mrf.mxu1 }
 0x214   : > { %v1571_v5 = vpop.f32.mrf.mxu1 }
 0x215   : > { %v1585_v6 = vadd.f32 %v1584_v50, %v1571_v5 }
 0x217   : > { %v1598_v7 = vadd.f32 %v1597_v51, %v1585_v6 }
 0x219   : > { %v1603_v8 = vpack.c.bf16 %v1598_v7, %v1598_v7 }
 0x21b   : > { %v1608_v59 = vsel %vm822_vm0, %v1603_v8, 0 }
 0x21c   : > { %v1573_v56 = vpop.f32.mrf.mxu1  ;;  %1617 = vmatpush.bf16.msrb.mxu3 %v1608_v59 }
 0x21f   : > { %2227 = vmatmul.msk.bf16.vlgmr.msrb.gmra.mxu3 %vm1093_vm3, %v2226_v9 }
 0x2a2   : > { %v1619_v61 = vpop.f32.mrf.mxu3 }
 0x2a3   : > { %v1623_v11 = vadd.f32 %v1619_v61, %v1377_v2 }
 0x2a5   : > { %v1630_v12 = vadd.f32 %v1628_v10, %v1623_v11 }
 0x2a7   : > { %1632 = vst.msk [vmem:[%s289_s28] sm:$0xff] %vm1631_vm4, %v1630_v12 }
 0x2aa   : > { %v1621_v13 = vpop.f32.mrf.mxu3 }
 0x2ab PF: > { %s18_s24 = sadd.s32 1, %s2339_s24  }
 0x2ac   : > { %p15_p4 = scmp.ge.s32.totalorder %s18_s24, 4  }
 0x2ae   :  { %17 = sbr.rel (!%p15_p4) target bundleno = 1 (0x1), region = 92 }

</bundles_post_ra>
